<compile_context>
chip_gen: v5e
topology: v5e:2x2
jax: 0.10.0
libtpu: 0.0.40
codegen_flags: <defaults>
</compile_context>

<pallas_src>
import math
import numpy as np
import jax
import jax.numpy as jnp
from jax import lax
from jax.experimental import pallas as pl
from jax.experimental.pallas import tpu as pltpu

LRELU_SLOPE = 0.2

# fixed decoder geometry (img_sz=16, ngf=8, nz_enc=32, input_nc=3, n_masks=2)
NZ_ENC = 32
C0 = 16          # first-dec channels (ngf * 2**(n-3))
C1 = 8           # pyramid-0 output channels (ngf)
C2 = 8           # additional_conv_layer output channels == feat channels
IMG = 16
H1 = W1 = 8      # spatial size after firstdec + first x2 upsample
H2 = W2 = 16     # spatial size after second x2 upsample (== img_sz)
N_RGB = 3
N_MASK = 2
N_HEAD = N_RGB + N_MASK
LANES = 128


# -------------- tiny block-local operator constants (batch independent) ----------
def _build_shift_taps(H):
    """rows [0:H)  : selector for conv tap di=0 (reads image row h-1, zero pad)
       rows [H:2H) : selector for conv tap di=2 (reads image row h+1, zero pad)"""
    out = np.zeros((2, H, H), np.float32)
    for h in range(H):
        if h - 1 >= 0:
            out[0, h, h - 1] = 1.0
        if h + 1 < H:
            out[1, h, h + 1] = 1.0
    return out.reshape(2 * H, H)


def _build_upsample_taps():
    """uhd[di] = S16_di @ UH : output row h2 selects L1 row (h2+di-1)//2 (0 outside),
    i.e. the x2 row-duplication and the L2 vertical tap fused into one selector."""
    out = np.zeros((3, H2, H1), np.float32)
    for di in range(3):
        for h2 in range(H2):
            src = h2 + di - 1
            if 0 <= src < H2:
                out[di, h2, src // 2] = 1.0
    return out.reshape(3 * H2, H1)


def _build_mask_broadcast():
    """(128,128) operator copying the mask0 lanes [48,64) to every plane position
    k*16+w (k = R,G,B,mask0,mask1); all other output columns are zero."""
    A = np.zeros((LANES, LANES), np.float32)
    for w in range(W2):
        for k in range(N_HEAD):
            A[N_RGB * W2 + w, k * W2 + w] = 1.0
    return A


def _upsample_w_mat(W, C):
    """x2 nearest width-upsample of a (rows, W*C) slab as  X @ UW."""
    UW = np.zeros((W * C, 2 * W * C), np.float32)
    for w in range(W):
        for c in range(C):
            UW[w * C + c, (2 * w) * C + c] = 1.0
            UW[w * C + c, (2 * w + 1) * C + c] = 1.0
    return UW


# ---------------- weight packing (done once at init, bias folded in) -------------
def _pack_first_dec(Wf, bf):
    """Wf: (nz, 4, 4, C0) conv-transpose weight -> (4*nz + 1, 8*C0) slab mapping the
    wrapper-built z_aug (8 rows/img, 4*nz lanes) straight to the x2-width-upsampled
    8x8 activation; bias folded as a trailing row."""
    nz, Hs, Ws, C = Wf.shape
    dup = Wf[:, :, np.repeat(np.arange(Ws), 2), :]              # (nz, 4, 8, C)
    W_A = np.transpose(dup, (1, 0, 2, 3)).reshape(Hs * nz, 2 * Ws * C)
    b_row = np.tile(bf, 2 * Ws)[None, :]
    return np.concatenate([W_A, b_row], axis=0).astype(np.float32)


def _pack_conv(Wc, bc, W):
    """Wc: (3, 3, Cin, Cout) -> (3*W*Cin + 1, W*Cout): one banded block per vertical
    tap (horizontal taps + channel contraction on a row-flattened (rows, W*Cin)
    slab, zero padded at the W borders), output columns (w*Cout + c), plus a
    trailing bias row."""
    _, _, Cin, Cout = Wc.shape
    M = np.zeros((3, W * Cin, W * Cout), np.float32)
    for di in range(3):
        for dj in range(3):
            for wo in range(W):
                wi = wo + dj - 1
                if 0 <= wi < W:
                    M[di, wi * Cin:(wi + 1) * Cin,
                      wo * Cout:(wo + 1) * Cout] += Wc[di, dj]
    b_row = np.tile(bc, W)[None, :]
    return np.concatenate([M.reshape(3 * W * Cin, W * Cout), b_row],
                          axis=0).astype(np.float32)


def _pack_head_conv(Wc, bc, W, lanes):
    """Like _pack_conv but output columns are plane-major (c*W + w) and zero padded
    to `lanes`, so the fused head conv directly produces the final lane layout."""
    _, _, Cin, Cout = Wc.shape
    M = np.zeros((3, W * Cin, lanes), np.float32)
    for di in range(3):
        for dj in range(3):
            for wo in range(W):
                wi = wo + dj - 1
                if 0 <= wi < W:
                    for co in range(Cout):
                        M[di, wi * Cin:(wi + 1) * Cin, co * W + wo] += Wc[di, dj, :, co]
    b_row = np.zeros((1, lanes), np.float32)
    for co in range(Cout):
        b_row[0, co * W:(co + 1) * W] = bc[co]
    return np.concatenate([M.reshape(3 * W * Cin, lanes), b_row],
                          axis=0).astype(np.float32)


# ---------------------------- the fused decoder kernel ---------------------------
def decoder_kernel(zaug_ref, pix_ref, wA_ref, wB_ref, wD_ref, wE_ref,
                   uhd_ref, sh8_ref, sh16_ref, bcast_ref, feat_ref, head_ref):
    K1 = W1 * C0          # 128 : lane width of the 8x8 / 16-ch slab
    KD = W1 * C1          # 64  : lane width of the L1 output slab
    K2 = W2 * C2          # 128 : lane width of the 16x16 / 8-ch slabs

    def mm(a, b):
        return jnp.dot(a, b, preferred_element_type=jnp.float32)

    def leaky(x):
        return jnp.where(x >= 0.0, x, LRELU_SLOPE * x)

    def taps(x, sh_ref, H):
        # vertical conv taps di = 0, 1, 2.  Block == one image, so the tiny
        # block-local (H,H) selectors already carry the zero padding.
        return (mm(sh_ref[0:H, :], x), x, mm(sh_ref[H:2 * H, :], x))

    # --- L0 ConvBlockFirstDec (x2 width-upsample folded into wA), LeakyReLU -------
    x8 = leaky(mm(zaug_ref[...], wA_ref[0:4 * NZ_ENC, :])
               + wA_ref[4 * NZ_ENC:4 * NZ_ENC + 1, :])           # (8, 128)

    # --- L1 pyramid-0: 3x3 conv 16 -> 8, LeakyReLU ---------------------------------
    y = wB_ref[3 * K1:3 * K1 + 1, :]
    for di, xt in enumerate(taps(x8, sh8_ref, H1)):
        y = y + mm(xt, wB_ref[di * K1:(di + 1) * K1, :])
    y = leaky(y)                                                 # (8, 64)

    # --- L2 additional_conv_layer: x2 upsample + 3x3 conv 8 -> 8, Tanh -> feat -----
    #     (width dup folded into wD columns, height dup + vertical tap in uhd)
    f = wD_ref[3 * KD:3 * KD + 1, :]
    for di in range(3):
        f = f + mm(mm(uhd_ref[di * H2:(di + 1) * H2, :], y),
                   wD_ref[di * KD:(di + 1) * KD, :])
    feat = jnp.tanh(f)                                           # (16, 128)
    feat_ref[...] = feat

    # --- fused gen_head (Tanh) + mask_head (2-way softmax) + copy-merge ------------
    #     wE output columns are plane-major: lanes [0,48) = RGB gen logits,
    #     lanes [48,64) = mask logit difference l0-l1, lanes [64,128) = 0.
    t = wE_ref[3 * K2:3 * K2 + 1, :]
    for di, ft in enumerate(taps(feat, sh16_ref, H2)):
        t = t + mm(ft, wE_ref[di * K2:(di + 1) * K2, :])

    lane = lax.broadcasted_iota(jnp.int32, (H2, LANES), 1)
    is_rgb = lane < N_RGB * W2
    is_m0 = (lane >= N_RGB * W2) & (lane < (N_RGB + 1) * W2)
    is_m1 = (lane >= (N_RGB + 1) * W2) & (lane < (N_RGB + 2) * W2)

    gen = jnp.tanh(t)                                 # gen_head images (RGB lanes)
    e = jnp.exp(-jnp.abs(t))                          # stable sigmoid(l0 - l1)
    p0 = jnp.where(t >= 0.0, 1.0 / (1.0 + e), e / (1.0 + e))
    p0 = jnp.where(is_m0, p0, 0.0)
    pb = mm(p0, bcast_ref[...])                       # p0 replicated to every plane

    merged = pb * pix_ref[...] + (1.0 - pb) * gen     # mask0*pix + mask1*gen
    head_ref[...] = jnp.where(is_rgb, merged,
                    jnp.where(is_m0, pb,
                    jnp.where(is_m1, 1.0 - pb, 0.0)))


# ------------------------------- parameter init ----------------------------------
def init_decoder_params(key):
    def xavier(k, shape, fan_in, fan_out):
        bound = math.sqrt(6.0 / (fan_in + fan_out))
        return jax.random.uniform(k, shape, jnp.float32, -bound, bound)

    ks = jax.random.split(key, 10)
    Wf = xavier(ks[0], (NZ_ENC, 4, 4, C0), NZ_ENC * 16, C0 * 16)   # ConvTranspose 4x4
    Wp = xavier(ks[1], (3, 3, C0, C1), C0 * 9, C1 * 9)
    Wa = xavier(ks[2], (3, 3, C1, C2), C1 * 9, C2 * 9)
    Wg = xavier(ks[3], (3, 3, C2, N_RGB), C2 * 9, N_RGB * 9)
    Wm = xavier(ks[4], (3, 3, C2, N_MASK), C2 * 9, N_MASK * 9)
    bf = jax.random.uniform(ks[5], (C0,), jnp.float32, -0.1, 0.1)
    bp = jax.random.uniform(ks[6], (C1,), jnp.float32, -0.1, 0.1)
    ba = jax.random.uniform(ks[7], (C2,), jnp.float32, -0.1, 0.1)
    bg = jax.random.uniform(ks[8], (N_RGB,), jnp.float32, -0.1, 0.1)
    bm = jax.random.uniform(ks[9], (N_MASK,), jnp.float32, -0.1, 0.1)
    conceptual = dict(Wf=Wf, bf=bf, Wp=Wp, bp=bp, Wa=Wa, ba=ba,
                      Wg=Wg, bg=bg, Wm=Wm, bm=bm)

    Wf_n, Wp_n, Wa_n = np.asarray(Wf), np.asarray(Wp), np.asarray(Wa)
    Wg_n, Wm_n = np.asarray(Wg), np.asarray(Wm)
    bf_n, bp_n, ba_n = np.asarray(bf), np.asarray(bp), np.asarray(ba)
    bg_n, bm_n = np.asarray(bg), np.asarray(bm)

    # L2 conv with the x2 width-upsample folded into its columns: (3*64 + 1, 128)
    wD_full = _pack_conv(Wa_n, ba_n, W2)                     # (3*128 + 1, 128)
    UW = _upsample_w_mat(W1, C1)                             # (64, 128)
    KD = W2 * C2                                             # 128
    taps_folded = [UW @ wD_full[di * KD:(di + 1) * KD, :] for di in range(3)]
    wD_folded = np.concatenate(taps_folded + [wD_full[3 * KD:, :]], axis=0)

    # gen_head + mask_head fused; mask column = softmax logit difference (l0 - l1)
    Wh = np.concatenate([Wg_n, Wm_n[..., 0:1] - Wm_n[..., 1:2]], axis=3)   # (3,3,8,4)
    bh = np.concatenate([bg_n, bm_n[0:1] - bm_n[1:2]], axis=0)             # (4,)

    packed = dict(
        wA=jnp.asarray(_pack_first_dec(Wf_n, bf_n)),         # (129, 128)
        wB=jnp.asarray(_pack_conv(Wp_n, bp_n, W1)),           # (385, 64)
        wD=jnp.asarray(wD_folded),                            # (193, 128)
        wE=jnp.asarray(_pack_head_conv(Wh, bh, W2, LANES)),   # (385, 128)
        uhd=jnp.asarray(_build_upsample_taps()),              # (48, 8)
        sh8=jnp.asarray(_build_shift_taps(H1)),               # (16, 8)
        sh16=jnp.asarray(_build_shift_taps(H2)),              # (32, 16)
        bcast=jnp.asarray(_build_mask_broadcast()),           # (128, 128)
    )
    return conceptual, packed


# --------------------------------- wrapper ----------------------------------------
_SEL_H = np.repeat(np.eye(4, dtype=np.float32), 2, axis=0)     # (8, 4): h2 -> h2 // 2


def pixel_copy_decoder_forward(packed, z, pixel_source):
    """z: (B, nz_enc); pixel_source: (B, 3, 16, 16) NCHW.
    Returns (feat (B,8,16,16), images (B,3,16,16), pixel_copy_mask (B,2,16,16))."""
    B = z.shape[0]

    # wrapper-side layout plumbing (tiny XLA ops, no learned-weight math)
    zaug = (jnp.asarray(_SEL_H)[None, :, :, None] * z[:, None, None, :]
            ).reshape(B * H1, 4 * NZ_ENC)                              # (B*8, 128)
    pix = jnp.transpose(pixel_source, (0, 2, 1, 3)).reshape(B * H2, N_RGB * W2)
    pix = jnp.pad(pix, ((0, 0), (0, LANES - N_RGB * W2)))              # (B*16, 128)

    flops = B * (2 * 8 * 128 * 128                   # L0
                 + 2 * 2 * 8 * 8 * 128               # L1 shift taps
                 + 3 * 2 * 8 * 128 * 64              # L1
                 + 3 * (2 * 16 * 8 * 64 + 2 * 16 * 64 * 128)   # L2 (+ row-dup fold)
                 + 2 * 2 * 16 * 16 * 128             # head shift taps
                 + 3 * 2 * 16 * 128 * 128            # head conv
                 + 2 * 16 * 128 * 128)               # mask broadcast
    transcendentals = B * 3 * 16 * 128               # tanh(feat), tanh(gen), exp
    bytes_accessed = 4 * (129 * 128 + 385 * 64 + 193 * 128 + 385 * 128
                          + 48 * 8 + 16 * 8 + 32 * 16 + 128 * 128
                          + B * (8 * 128 + 16 * 128 + 2 * 16 * 128))

    def weight_spec(a):
        return pl.BlockSpec(a.shape, lambda b: (0, 0))      # VMEM-resident

    feat2d, head2d = pl.pallas_call(
        decoder_kernel,
        grid=(B,),
        out_shape=(jax.ShapeDtypeStruct((B * H2, LANES), jnp.float32),
                   jax.ShapeDtypeStruct((B * H2, LANES), jnp.float32)),
        in_specs=[
            pl.BlockSpec((H1, LANES), lambda b: (b, 0)),     # zaug  (per image)
            pl.BlockSpec((H2, LANES), lambda b: (b, 0)),     # pixel (per image)
            weight_spec(packed["wA"]),
            weight_spec(packed["wB"]),
            weight_spec(packed["wD"]),
            weight_spec(packed["wE"]),
            weight_spec(packed["uhd"]),
            weight_spec(packed["sh8"]),
            weight_spec(packed["sh16"]),
            weight_spec(packed["bcast"]),
        ],
        out_specs=(pl.BlockSpec((H2, LANES), lambda b: (b, 0)),
                   pl.BlockSpec((H2, LANES), lambda b: (b, 0))),
        compiler_params=pltpu.CompilerParams(dimension_semantics=("parallel",)),
        cost_estimate=pl.CostEstimate(flops=flops, transcendentals=transcendentals,
                                      bytes_accessed=bytes_accessed),
    )(zaug, pix, packed["wA"], packed["wB"], packed["wD"], packed["wE"],
      packed["uhd"], packed["sh8"], packed["sh16"], packed["bcast"])

    feat = feat2d.reshape(B, H2, W2, C2).transpose(0, 3, 1, 2)
    planes = head2d.reshape(B, H2, LANES // W2, W2)[:, :, :N_HEAD, :].transpose(0, 2, 1, 3)
    images = planes[:, :N_RGB]
    mask = planes[:, N_RGB:]
    return feat, images, mask


# ------------------------- plain-JAX reference (for checking) ---------------------
def reference_forward(cw, z, pixel_source):
    leaky = lambda x: jnp.where(x >= 0.0, x, LRELU_SLOPE * x)
    up2 = lambda x: jnp.repeat(jnp.repeat(x, 2, axis=1), 2, axis=2)
    conv3 = lambda x, w, b: lax.conv_general_dilated(
        x, w, (1, 1), 'SAME', dimension_numbers=('NHWC', 'HWIO', 'NHWC')) + b

    x = leaky(jnp.einsum('bi,ihwc->bhwc', z, cw['Wf']) + cw['bf'])      # (B,4,4,16)
    x = leaky(conv3(up2(x), cw['Wp'], cw['bp']))                         # (B,8,8,8)
    feat = jnp.tanh(conv3(up2(x), cw['Wa'], cw['ba']))                   # (B,16,16,8)
    gen = jnp.tanh(conv3(feat, cw['Wg'], cw['bg']))                      # (B,16,16,3)
    mask = jax.nn.softmax(conv3(feat, cw['Wm'], cw['bm']), axis=-1)      # (B,16,16,2)
    pix = jnp.transpose(pixel_source, (0, 2, 3, 1))
    images = mask[..., 0:1] * pix + mask[..., 1:2] * gen
    return (feat.transpose(0, 3, 1, 2), images.transpose(0, 3, 1, 2),
            mask.transpose(0, 3, 1, 2))


if __name__ == "__main__":
    B = 2
    key = jax.random.PRNGKey(0)
    kp, kz, kx = jax.random.split(key, 3)
    conceptual, packed = init_decoder_params(kp)

    z = jax.random.normal(kz, (B, NZ_ENC), jnp.float32)
    pixel_source = jax.random.uniform(kx, (B, N_RGB, IMG, IMG), jnp.float32, -1.0, 1.0)

    feat, images, mask = jax.block_until_ready(
        pixel_copy_decoder_forward(packed, z, pixel_source))

    assert feat.shape == (B, C2, IMG, IMG)
    assert images.shape == (B, N_RGB, IMG, IMG)
    assert mask.shape == (B, N_MASK, IMG, IMG)
    for a in (feat, images, mask):
        assert bool(jnp.all(jnp.isfinite(a)))

    # numerical check against a plain-JAX reference of the same decoder
    rfeat, rimages, rmask = reference_forward(conceptual, z, pixel_source)
    for got, ref, name in ((feat, rfeat, "feat"), (images, rimages, "images"),
                           (mask, rmask, "mask")):
        err = float(jnp.max(jnp.abs(got - ref)))
        assert err < 1e-4, f"{name} mismatch: max abs err {err}"

    print("KERNEL_OK")
</pallas_src>

<mosaic_0001>
module attributes {stable_mosaic.version = 11 : i64} {
  func.func @decoder_kernel(%arg0: i32, %arg1: memref<8x128xf32, #tpu.memory_space<vmem>>, %arg2: memref<16x128xf32, #tpu.memory_space<vmem>>, %arg3: memref<129x128xf32, #tpu.memory_space<vmem>>, %arg4: memref<385x64xf32, #tpu.memory_space<vmem>>, %arg5: memref<193x128xf32, #tpu.memory_space<vmem>>, %arg6: memref<385x128xf32, #tpu.memory_space<vmem>>, %arg7: memref<48x8xf32, #tpu.memory_space<vmem>>, %arg8: memref<16x8xf32, #tpu.memory_space<vmem>>, %arg9: memref<32x16xf32, #tpu.memory_space<vmem>>, %arg10: memref<128x128xf32, #tpu.memory_space<vmem>>, %arg11: memref<16x128xf32, #tpu.memory_space<vmem>>, %arg12: memref<16x128xf32, #tpu.memory_space<vmem>>) attributes {dimension_semantics = [#tpu.dimension_semantics<parallel>], iteration_bounds = array<i64: 2>, scalar_prefetch = 0 : i64, scratch_operands = 0 : i64, tpu.core_type = #tpu.core_type<tc>, window_params = [{transform_indices = @transform_0, window_bounds = array<i64: 8, 128>}, {transform_indices = @transform_1, window_bounds = array<i64: 16, 128>}, {pipeline_mode = #tpu.pipeline_mode<synchronous>, transform_indices = @transform_2, window_bounds = array<i64: 129, 128>}, {pipeline_mode = #tpu.pipeline_mode<synchronous>, transform_indices = @transform_3, window_bounds = array<i64: 385, 64>}, {pipeline_mode = #tpu.pipeline_mode<synchronous>, transform_indices = @transform_4, window_bounds = array<i64: 193, 128>}, {pipeline_mode = #tpu.pipeline_mode<synchronous>, transform_indices = @transform_5, window_bounds = array<i64: 385, 128>}, {pipeline_mode = #tpu.pipeline_mode<synchronous>, transform_indices = @transform_6, window_bounds = array<i64: 48, 8>}, {pipeline_mode = #tpu.pipeline_mode<synchronous>, transform_indices = @transform_7, window_bounds = array<i64: 16, 8>}, {pipeline_mode = #tpu.pipeline_mode<synchronous>, transform_indices = @transform_8, window_bounds = array<i64: 32, 16>}, {pipeline_mode = #tpu.pipeline_mode<synchronous>, transform_indices = @transform_9, window_bounds = array<i64: 128, 128>}, {transform_indices = @transform_10, window_bounds = array<i64: 16, 128>}, {transform_indices = @transform_11, window_bounds = array<i64: 16, 128>}]} {
    %c0 = arith.constant 0 : index
    %c0_0 = arith.constant 0 : index
    %0 = vector.load %arg1[%c0, %c0_0] : memref<8x128xf32, #tpu.memory_space<vmem>>, vector<8x128xf32>
    %c0_1 = arith.constant 0 : index
    %c0_2 = arith.constant 0 : index
    %1 = vector.load %arg3[%c0_1, %c0_2] : memref<129x128xf32, #tpu.memory_space<vmem>>, vector<128x128xf32>
    %cst = arith.constant dense<0.000000e+00> : vector<8x128xf32>
    %2 = tpu.matmul %0, %1, %cst {dimension_numbers = #tpu.dot_dimension_numbers<[1], [0], [0], [1], [0, 0, 1, 1], [], []>} : vector<8x128xf32>, vector<128x128xf32>, vector<8x128xf32> -> vector<8x128xf32>
    %c128 = arith.constant 128 : index
    %c0_3 = arith.constant 0 : index
    %3 = vector.load %arg3[%c128, %c0_3] : memref<129x128xf32, #tpu.memory_space<vmem>>, vector<1x128xf32>
    %4 = vector.broadcast %3 : vector<1x128xf32> to vector<8x128xf32>
    %5 = arith.addf %2, %4 : vector<8x128xf32>
    %cst_4 = arith.constant 0.000000e+00 : f32
    %6 = vector.broadcast %cst_4 : f32 to vector<8x128xf32>
    %7 = arith.cmpf oge, %5, %6 : vector<8x128xf32>
    %cst_5 = arith.constant 2.000000e-01 : f32
    %8 = vector.broadcast %cst_5 : f32 to vector<8x128xf32>
    %9 = arith.mulf %8, %5 : vector<8x128xf32>
    %10 = arith.select %7, %5, %9 : vector<8x128xi1>, vector<8x128xf32>
    %c384 = arith.constant 384 : index
    %c0_6 = arith.constant 0 : index
    %11 = vector.load %arg4[%c384, %c0_6] : memref<385x64xf32, #tpu.memory_space<vmem>>, vector<1x64xf32>
    %c0_7 = arith.constant 0 : index
    %c0_8 = arith.constant 0 : index
    %12 = vector.load %arg8[%c0_7, %c0_8] : memref<16x8xf32, #tpu.memory_space<vmem>>, vector<8x8xf32>
    %cst_9 = arith.constant dense<0.000000e+00> : vector<8x128xf32>
    %13 = tpu.matmul %12, %10, %cst_9 {dimension_numbers = #tpu.dot_dimension_numbers<[1], [0], [0], [1], [0, 0, 1, 1], [], []>} : vector<8x8xf32>, vector<8x128xf32>, vector<8x128xf32> -> vector<8x128xf32>
    %c8 = arith.constant 8 : index
    %c0_10 = arith.constant 0 : index
    %14 = vector.load %arg8[%c8, %c0_10] : memref<16x8xf32, #tpu.memory_space<vmem>>, vector<8x8xf32>
    %cst_11 = arith.constant dense<0.000000e+00> : vector<8x128xf32>
    %15 = tpu.matmul %14, %10, %cst_11 {dimension_numbers = #tpu.dot_dimension_numbers<[1], [0], [0], [1], [0, 0, 1, 1], [], []>} : vector<8x8xf32>, vector<8x128xf32>, vector<8x128xf32> -> vector<8x128xf32>
    %c0_12 = arith.constant 0 : index
    %c0_13 = arith.constant 0 : index
    %16 = vector.load %arg4[%c0_12, %c0_13] : memref<385x64xf32, #tpu.memory_space<vmem>>, vector<128x64xf32>
    %cst_14 = arith.constant dense<0.000000e+00> : vector<8x64xf32>
    %17 = tpu.matmul %13, %16, %cst_14 {dimension_numbers = #tpu.dot_dimension_numbers<[1], [0], [0], [1], [0, 0, 1, 1], [], []>} : vector<8x128xf32>, vector<128x64xf32>, vector<8x64xf32> -> vector<8x64xf32>
    %18 = vector.broadcast %11 : vector<1x64xf32> to vector<8x64xf32>
    %19 = arith.addf %18, %17 : vector<8x64xf32>
    %c128_15 = arith.constant 128 : index
    %c0_16 = arith.constant 0 : index
    %20 = vector.load %arg4[%c128_15, %c0_16] : memref<385x64xf32, #tpu.memory_space<vmem>>, vector<128x64xf32>
    %cst_17 = arith.constant dense<0.000000e+00> : vector<8x64xf32>
    %21 = tpu.matmul %10, %20, %cst_17 {dimension_numbers = #tpu.dot_dimension_numbers<[1], [0], [0], [1], [0, 0, 1, 1], [], []>} : vector<8x128xf32>, vector<128x64xf32>, vector<8x64xf32> -> vector<8x64xf32>
    %22 = arith.addf %19, %21 : vector<8x64xf32>
    %c256 = arith.constant 256 : index
    %c0_18 = arith.constant 0 : index
    %23 = vector.load %arg4[%c256, %c0_18] : memref<385x64xf32, #tpu.memory_space<vmem>>, vector<128x64xf32>
    %cst_19 = arith.constant dense<0.000000e+00> : vector<8x64xf32>
    %24 = tpu.matmul %15, %23, %cst_19 {dimension_numbers = #tpu.dot_dimension_numbers<[1], [0], [0], [1], [0, 0, 1, 1], [], []>} : vector<8x128xf32>, vector<128x64xf32>, vector<8x64xf32> -> vector<8x64xf32>
    %25 = arith.addf %22, %24 : vector<8x64xf32>
    %cst_20 = arith.constant 0.000000e+00 : f32
    %26 = vector.broadcast %cst_20 : f32 to vector<8x64xf32>
    %27 = arith.cmpf oge, %25, %26 : vector<8x64xf32>
    %cst_21 = arith.constant 2.000000e-01 : f32
    %28 = vector.broadcast %cst_21 : f32 to vector<8x64xf32>
    %29 = arith.mulf %28, %25 : vector<8x64xf32>
    %30 = arith.select %27, %25, %29 : vector<8x64xi1>, vector<8x64xf32>
    %c192 = arith.constant 192 : index
    %c0_22 = arith.constant 0 : index
    %31 = vector.load %arg5[%c192, %c0_22] : memref<193x128xf32, #tpu.memory_space<vmem>>, vector<1x128xf32>
    %c0_23 = arith.constant 0 : index
    %c0_24 = arith.constant 0 : index
    %32 = vector.load %arg7[%c0_23, %c0_24] : memref<48x8xf32, #tpu.memory_space<vmem>>, vector<16x8xf32>
    %cst_25 = arith.constant dense<0.000000e+00> : vector<16x64xf32>
    %33 = tpu.matmul %32, %30, %cst_25 {dimension_numbers = #tpu.dot_dimension_numbers<[1], [0], [0], [1], [0, 0, 1, 1], [], []>} : vector<16x8xf32>, vector<8x64xf32>, vector<16x64xf32> -> vector<16x64xf32>
    %c0_26 = arith.constant 0 : index
    %c0_27 = arith.constant 0 : index
    %34 = vector.load %arg5[%c0_26, %c0_27] : memref<193x128xf32, #tpu.memory_space<vmem>>, vector<64x128xf32>
    %cst_28 = arith.constant dense<0.000000e+00> : vector<16x128xf32>
    %35 = tpu.matmul %33, %34, %cst_28 {dimension_numbers = #tpu.dot_dimension_numbers<[1], [0], [0], [1], [0, 0, 1, 1], [], []>} : vector<16x64xf32>, vector<64x128xf32>, vector<16x128xf32> -> vector<16x128xf32>
    %36 = vector.broadcast %31 : vector<1x128xf32> to vector<16x128xf32>
    %37 = arith.addf %36, %35 : vector<16x128xf32>
    %c16 = arith.constant 16 : index
    %c0_29 = arith.constant 0 : index
    %38 = vector.load %arg7[%c16, %c0_29] : memref<48x8xf32, #tpu.memory_space<vmem>>, vector<16x8xf32>
    %cst_30 = arith.constant dense<0.000000e+00> : vector<16x64xf32>
    %39 = tpu.matmul %38, %30, %cst_30 {dimension_numbers = #tpu.dot_dimension_numbers<[1], [0], [0], [1], [0, 0, 1, 1], [], []>} : vector<16x8xf32>, vector<8x64xf32>, vector<16x64xf32> -> vector<16x64xf32>
    %c64 = arith.constant 64 : index
    %c0_31 = arith.constant 0 : index
    %40 = vector.load %arg5[%c64, %c0_31] : memref<193x128xf32, #tpu.memory_space<vmem>>, vector<64x128xf32>
    %cst_32 = arith.constant dense<0.000000e+00> : vector<16x128xf32>
    %41 = tpu.matmul %39, %40, %cst_32 {dimension_numbers = #tpu.dot_dimension_numbers<[1], [0], [0], [1], [0, 0, 1, 1], [], []>} : vector<16x64xf32>, vector<64x128xf32>, vector<16x128xf32> -> vector<16x128xf32>
    %42 = arith.addf %37, %41 : vector<16x128xf32>
    %c32 = arith.constant 32 : index
    %c0_33 = arith.constant 0 : index
    %43 = vector.load %arg7[%c32, %c0_33] : memref<48x8xf32, #tpu.memory_space<vmem>>, vector<16x8xf32>
    %cst_34 = arith.constant dense<0.000000e+00> : vector<16x64xf32>
    %44 = tpu.matmul %43, %30, %cst_34 {dimension_numbers = #tpu.dot_dimension_numbers<[1], [0], [0], [1], [0, 0, 1, 1], [], []>} : vector<16x8xf32>, vector<8x64xf32>, vector<16x64xf32> -> vector<16x64xf32>
    %c128_35 = arith.constant 128 : index
    %c0_36 = arith.constant 0 : index
    %45 = vector.load %arg5[%c128_35, %c0_36] : memref<193x128xf32, #tpu.memory_space<vmem>>, vector<64x128xf32>
    %cst_37 = arith.constant dense<0.000000e+00> : vector<16x128xf32>
    %46 = tpu.matmul %44, %45, %cst_37 {dimension_numbers = #tpu.dot_dimension_numbers<[1], [0], [0], [1], [0, 0, 1, 1], [], []>} : vector<16x64xf32>, vector<64x128xf32>, vector<16x128xf32> -> vector<16x128xf32>
    %47 = arith.addf %42, %46 : vector<16x128xf32>
    %48 = math.tanh %47 : vector<16x128xf32>
    %c0_38 = arith.constant 0 : index
    %c0_39 = arith.constant 0 : index
    %49 = vector.load %arg11[%c0_38, %c0_39] : memref<16x128xf32, #tpu.memory_space<vmem>>, vector<16x128xf32>
    tpu.vector_store %arg11[%c0_38, %c0_39], %48 {strides = array<i32>} : memref<16x128xf32, #tpu.memory_space<vmem>>, vector<16x128xf32>,
    %c384_40 = arith.constant 384 : index
    %c0_41 = arith.constant 0 : index
    %50 = vector.load %arg6[%c384_40, %c0_41] : memref<385x128xf32, #tpu.memory_space<vmem>>, vector<1x128xf32>
    %c0_42 = arith.constant 0 : index
    %c0_43 = arith.constant 0 : index
    %51 = vector.load %arg9[%c0_42, %c0_43] : memref<32x16xf32, #tpu.memory_space<vmem>>, vector<16x16xf32>
    %cst_44 = arith.constant dense<0.000000e+00> : vector<16x128xf32>
    %52 = tpu.matmul %51, %48, %cst_44 {dimension_numbers = #tpu.dot_dimension_numbers<[1], [0], [0], [1], [0, 0, 1, 1], [], []>} : vector<16x16xf32>, vector<16x128xf32>, vector<16x128xf32> -> vector<16x128xf32>
    %c16_45 = arith.constant 16 : index
    %c0_46 = arith.constant 0 : index
    %53 = vector.load %arg9[%c16_45, %c0_46] : memref<32x16xf32, #tpu.memory_space<vmem>>, vector<16x16xf32>
    %cst_47 = arith.constant dense<0.000000e+00> : vector<16x128xf32>
    %54 = tpu.matmul %53, %48, %cst_47 {dimension_numbers = #tpu.dot_dimension_numbers<[1], [0], [0], [1], [0, 0, 1, 1], [], []>} : vector<16x16xf32>, vector<16x128xf32>, vector<16x128xf32> -> vector<16x128xf32>
    %c0_48 = arith.constant 0 : index
    %c0_49 = arith.constant 0 : index
    %55 = vector.load %arg6[%c0_48, %c0_49] : memref<385x128xf32, #tpu.memory_space<vmem>>, vector<128x128xf32>
    %cst_50 = arith.constant dense<0.000000e+00> : vector<16x128xf32>
    %56 = tpu.matmul %52, %55, %cst_50 {dimension_numbers = #tpu.dot_dimension_numbers<[1], [0], [0], [1], [0, 0, 1, 1], [], []>} : vector<16x128xf32>, vector<128x128xf32>, vector<16x128xf32> -> vector<16x128xf32>
    %57 = vector.broadcast %50 : vector<1x128xf32> to vector<16x128xf32>
    %58 = arith.addf %57, %56 : vector<16x128xf32>
    %c128_51 = arith.constant 128 : index
    %c0_52 = arith.constant 0 : index
    %59 = vector.load %arg6[%c128_51, %c0_52] : memref<385x128xf32, #tpu.memory_space<vmem>>, vector<128x128xf32>
    %cst_53 = arith.constant dense<0.000000e+00> : vector<16x128xf32>
    %60 = tpu.matmul %48, %59, %cst_53 {dimension_numbers = #tpu.dot_dimension_numbers<[1], [0], [0], [1], [0, 0, 1, 1], [], []>} : vector<16x128xf32>, vector<128x128xf32>, vector<16x128xf32> -> vector<16x128xf32>
    %61 = arith.addf %58, %60 : vector<16x128xf32>
    %c256_54 = arith.constant 256 : index
    %c0_55 = arith.constant 0 : index
    %62 = vector.load %arg6[%c256_54, %c0_55] : memref<385x128xf32, #tpu.memory_space<vmem>>, vector<128x128xf32>
    %cst_56 = arith.constant dense<0.000000e+00> : vector<16x128xf32>
    %63 = tpu.matmul %54, %62, %cst_56 {dimension_numbers = #tpu.dot_dimension_numbers<[1], [0], [0], [1], [0, 0, 1, 1], [], []>} : vector<16x128xf32>, vector<128x128xf32>, vector<16x128xf32> -> vector<16x128xf32>
    %64 = arith.addf %61, %63 : vector<16x128xf32>
    %65 = tpu.iota {dimensions = array<i32: 1>} : vector<16x128xi32>
    %c48_i32 = arith.constant 48 : i32
    %66 = vector.broadcast %c48_i32 : i32 to vector<16x128xi32>
    %67 = arith.cmpi slt, %65, %66 : vector<16x128xi32>
    %c48_i32_57 = arith.constant 48 : i32
    %68 = vector.broadcast %c48_i32_57 : i32 to vector<16x128xi32>
    %69 = arith.cmpi sge, %65, %68 : vector<16x128xi32>
    %c64_i32 = arith.constant 64 : i32
    %70 = vector.broadcast %c64_i32 : i32 to vector<16x128xi32>
    %71 = arith.cmpi slt, %65, %70 : vector<16x128xi32>
    %72 = arith.andi %69, %71 : vector<16x128xi1>
    %c64_i32_58 = arith.constant 64 : i32
    %73 = vector.broadcast %c64_i32_58 : i32 to vector<16x128xi32>
    %74 = arith.cmpi sge, %65, %73 : vector<16x128xi32>
    %c80_i32 = arith.constant 80 : i32
    %75 = vector.broadcast %c80_i32 : i32 to vector<16x128xi32>
    %76 = arith.cmpi slt, %65, %75 : vector<16x128xi32>
    %77 = arith.andi %74, %76 : vector<16x128xi1>
    %78 = math.tanh %64 : vector<16x128xf32>
    %79 = math.absf %64 : vector<16x128xf32>
    %cst_59 = arith.constant 0.000000e+00 : f32
    %80 = vector.broadcast %cst_59 : f32 to vector<16x128xf32>
    %81 = arith.subf %80, %79 : vector<16x128xf32>
    %82 = math.exp %81 : vector<16x128xf32>
    %cst_60 = arith.constant 0.000000e+00 : f32
    %83 = vector.broadcast %cst_60 : f32 to vector<16x128xf32>
    %84 = arith.cmpf oge, %64, %83 : vector<16x128xf32>
    %cst_61 = arith.constant 1.000000e+00 : f32
    %85 = vector.broadcast %cst_61 : f32 to vector<16x128xf32>
    %86 = arith.addf %85, %82 : vector<16x128xf32>
    %cst_62 = arith.constant 1.000000e+00 : f32
    %87 = vector.broadcast %cst_62 : f32 to vector<16x128xf32>
    %88 = arith.divf %87, %86 : vector<16x128xf32>
    %cst_63 = arith.constant 1.000000e+00 : f32
    %89 = vector.broadcast %cst_63 : f32 to vector<16x128xf32>
    %90 = arith.addf %89, %82 : vector<16x128xf32>
    %91 = arith.divf %82, %90 : vector<16x128xf32>
    %92 = arith.select %84, %88, %91 : vector<16x128xi1>, vector<16x128xf32>
    %cst_64 = arith.constant 0.000000e+00 : f32
    %93 = vector.broadcast %cst_64 : f32 to vector<16x128xf32>
    %94 = arith.select %72, %92, %93 : vector<16x128xi1>, vector<16x128xf32>
    %c0_65 = arith.constant 0 : index
    %c0_66 = arith.constant 0 : index
    %95 = vector.load %arg10[%c0_65, %c0_66] : memref<128x128xf32, #tpu.memory_space<vmem>>, vector<128x128xf32>
    %cst_67 = arith.constant dense<0.000000e+00> : vector<16x128xf32>
    %96 = tpu.matmul %94, %95, %cst_67 {dimension_numbers = #tpu.dot_dimension_numbers<[1], [0], [0], [1], [0, 0, 1, 1], [], []>} : vector<16x128xf32>, vector<128x128xf32>, vector<16x128xf32> -> vector<16x128xf32>
    %c0_68 = arith.constant 0 : index
    %c0_69 = arith.constant 0 : index
    %97 = vector.load %arg2[%c0_68, %c0_69] : memref<16x128xf32, #tpu.memory_space<vmem>>, vector<16x128xf32>
    %98 = arith.mulf %96, %97 : vector<16x128xf32>
    %cst_70 = arith.constant 1.000000e+00 : f32
    %99 = vector.broadcast %cst_70 : f32 to vector<16x128xf32>
    %100 = arith.subf %99, %96 : vector<16x128xf32>
    %101 = arith.mulf %100, %78 : vector<16x128xf32>
    %102 = arith.addf %98, %101 : vector<16x128xf32>
    %cst_71 = arith.constant 1.000000e+00 : f32
    %103 = vector.broadcast %cst_71 : f32 to vector<16x128xf32>
    %104 = arith.subf %103, %96 : vector<16x128xf32>
    %cst_72 = arith.constant 0.000000e+00 : f32
    %105 = vector.broadcast %cst_72 : f32 to vector<16x128xf32>
    %106 = arith.select %77, %104, %105 : vector<16x128xi1>, vector<16x128xf32>
    %107 = arith.select %72, %96, %106 : vector<16x128xi1>, vector<16x128xf32>
    %108 = arith.select %67, %102, %107 : vector<16x128xi1>, vector<16x128xf32>
    %c0_73 = arith.constant 0 : index
    %c0_74 = arith.constant 0 : index
    %109 = vector.load %arg12[%c0_73, %c0_74] : memref<16x128xf32, #tpu.memory_space<vmem>>, vector<16x128xf32>
    tpu.vector_store %arg12[%c0_73, %c0_74], %108 {strides = array<i32>} : memref<16x128xf32, #tpu.memory_space<vmem>>, vector<16x128xf32>,
    return
  }
  func.func @transform_0(%arg0: i32) -> (i32, i32) {
    %c0_i32 = arith.constant 0 : i32
    %c0_i32_0 = arith.constant 0 : i32
    return %arg0, %c0_i32 : i32, i32
  }
  func.func @transform_1(%arg0: i32) -> (i32, i32) {
    %c0_i32 = arith.constant 0 : i32
    %c0_i32_0 = arith.constant 0 : i32
    return %arg0, %c0_i32 : i32, i32
  }
  func.func @transform_2(%arg0: i32) -> (i32, i32) {
    %c0_i32 = arith.constant 0 : i32
    %c0_i32_0 = arith.constant 0 : i32
    %c0_i32_1 = arith.constant 0 : i32
    return %c0_i32, %c0_i32_0 : i32, i32
  }
  func.func @transform_3(%arg0: i32) -> (i32, i32) {
    %c0_i32 = arith.constant 0 : i32
    %c0_i32_0 = arith.constant 0 : i32
    %c0_i32_1 = arith.constant 0 : i32
    return %c0_i32, %c0_i32_0 : i32, i32
  }
  func.func @transform_4(%arg0: i32) -> (i32, i32) {
    %c0_i32 = arith.constant 0 : i32
    %c0_i32_0 = arith.constant 0 : i32
    %c0_i32_1 = arith.constant 0 : i32
    return %c0_i32, %c0_i32_0 : i32, i32
  }
  func.func @transform_5(%arg0: i32) -> (i32, i32) {
    %c0_i32 = arith.constant 0 : i32
    %c0_i32_0 = arith.constant 0 : i32
    %c0_i32_1 = arith.constant 0 : i32
    return %c0_i32, %c0_i32_0 : i32, i32
  }
  func.func @transform_6(%arg0: i32) -> (i32, i32) {
    %c0_i32 = arith.constant 0 : i32
    %c0_i32_0 = arith.constant 0 : i32
    %c0_i32_1 = arith.constant 0 : i32
    return %c0_i32, %c0_i32_0 : i32, i32
  }
  func.func @transform_7(%arg0: i32) -> (i32, i32) {
    %c0_i32 = arith.constant 0 : i32
    %c0_i32_0 = arith.constant 0 : i32
    %c0_i32_1 = arith.constant 0 : i32
    return %c0_i32, %c0_i32_0 : i32, i32
  }
  func.func @transform_8(%arg0: i32) -> (i32, i32) {
    %c0_i32 = arith.constant 0 : i32
    %c0_i32_0 = arith.constant 0 : i32
    %c0_i32_1 = arith.constant 0 : i32
    return %c0_i32, %c0_i32_0 : i32, i32
  }
  func.func @transform_9(%arg0: i32) -> (i32, i32) {
    %c0_i32 = arith.constant 0 : i32
    %c0_i32_0 = arith.constant 0 : i32
    %c0_i32_1 = arith.constant 0 : i32
    return %c0_i32, %c0_i32_0 : i32, i32
  }
  func.func @transform_10(%arg0: i32) -> (i32, i32) {
    %c0_i32 = arith.constant 0 : i32
    %c0_i32_0 = arith.constant 0 : i32
    return %arg0, %c0_i32 : i32, i32
  }
  func.func @transform_11(%arg0: i32) -> (i32, i32) {
    %c0_i32 = arith.constant 0 : i32
    %c0_i32_0 = arith.constant 0 : i32
    return %arg0, %c0_i32 : i32, i32
  }
}

</mosaic_0001>

<bundles_post_ra>
// kernel: tpu_custom_call.1
= control target key start
LH: loop header
LB: loop body
LE: loop exit
PB: predicated region body
PF: predicated region fallthrough
CT: control target
= control target key end

     0   :  { %s2290_s0 = inlined_call_operand.vmem [shape: f32[16,128], index: 0, kind: input, shape index: {}]   ;;  %s2291_s1 = inlined_call_operand.vmem [shape: f32[32,128], index: 1, kind: input, shape index: {}]   ;;  %s2292_s2 = inlined_call_operand.vmem [shape: f32[129,128], index: 2, kind: input, shape index: {}]   ;;  %s2293_s3 = inlined_call_operand.vmem [shape: f32[385,64], index: 3, kind: input, shape index: {}]   ;;  %s2294_s4 = inlined_call_operand.vmem [shape: f32[193,128], index: 4, kind: input, shape index: {}]   ;;  %s2295_s5 = inlined_call_operand.vmem [shape: f32[385,128], index: 5, kind: input, shape index: {}]   ;;  %s2296_s6 = inlined_call_operand.vmem [shape: f32[48,8], index: 6, kind: input, shape index: {}]   ;;  %s2297_s7 = inlined_call_operand.vmem [shape: f32[16,8], index: 7, kind: input, shape index: {}]   ;;  %s2298_s8 = inlined_call_operand.vmem [shape: f32[32,16], index: 8, kind: input, shape index: {}]   ;;  %s2299_s9 = inlined_call_operand.hbm [shape: f32[128,128], index: 9, kind: input, shape index: {}]   ;;  %s2300_s10 = inlined_call_operand.hbm [shape: f32[32,128], index: 10, kind: output, shape index: {0}]   ;;  %s2301_s11 = inlined_call_operand.hbm [shape: f32[32,128], index: 11, kind: output, shape index: {1}]  }
   0x1   :  { %2304 = sst [smem:[#allocation13_spill]] %s2290_s0 }
   0x2   :  { %2305 = sst [smem:[#allocation14_spill]] %s2292_s2 }
   0x3   :  { %2306 = sst [smem:[#allocation15_spill]] %s2299_s9 }
   0x4   :  { %17 = vsyncpa [#allocation3], 0 }
   0x5   :  { %18 = vsyncpa [#allocation4], 0 }
   0x6   :  { %20 = vsyncpa [#allocation4 + $0x1], 0 }
   0x7   :  { %21 = vsyncpa [#allocation7], 0 }
   0x8   :  { %23 = vsyncpa [#allocation7 + $0x1], 0  ;;  %s1634_s17 = smov 0   ;;  %s1636_s18 = smov 0  }
   0x9   :  { %s1638_s19 = smov 0   ;;  %s1640_s20 = smov 0  }
   0xa LB: > { %2307 = sst [smem:[#allocation11_spill]] %s1563_s19  ;;  %s1655_s21 = sadd.s32 4294967295, %s1567_s20   ;;  %s1567_s20 = sphi %s1640_s20, %s2323_s20   ;;  %s1563_s19 = sphi %s1638_s19, %s2320_s19   ;;  %s1559_s18 = sphi %s1636_s18, %s2322_s18   ;;  %s1555_s17 = sphi %s1634_s17, %s2321_s17  }
   0xb   : > { %s1319_s22 = sadd.s32 4294967294, %s1567_s20   ;;  %s1659_s23 = sadd.s32 1, %s1567_s20  }
   0xc   : > { %s256_s24 = sadd.s32 1, %s1563_s19  ;;  %s253_s25 = ssub.s32 %s1567_s20, %s1659_s23 }
   0xd   : > { %p266_p0 = scmp.ne.s32.totalorder %s1563_s19, %s1559_s18  ;;  %p254_p1 = scmp.eq.s32.totalorder %s253_s25, 0 }
   0xe   : > { %p267_p2 = scmp.eq.s32.totalorder %s1655_s21, 1  ;;  %p272_p3 = scmp.ne.s32.totalorder %s1559_s18, %s1555_s17 }
   0xf   : > { %p273_p4 = scmp.eq.s32.totalorder %s1319_s22, 1  ;;  %p1320_p7 = scmp.ge.s32.totalorder %s1567_s20, 1 }
  0x10   : > { %s1670_s26 = scalar_select %p254_p1, %s1563_s19, %s256_s24  }
  0x11   : > { %p1672_p5 = por %p267_p2, %p266_p0  ;;  %p1676_p6 = por %p273_p4, %p272_p3 }
  0x12   : > { %2308 = sst [smem:[#allocation12_spill]] %s1670_s26  ;;  %p306_p8 = scmp.lt.s32.totalorder %s1567_s20, 3 }
  0x13   : > { %p1379_p9 = scmp.eq.s32.totalorder %s1655_s21, 0  ;;  %s2311_s9 = sld [smem:[#allocation15_spill]] }
  0x14   : > { %p307_p10 = pnand %p1320_p7, %p306_p8  ;;  %s1569_s13 = smov [#allocation2]  }
  0x15   : > { %s340_s14 = sshll.u32 %s1569_s13, 4  ;;  %s1570_s15 = smov 128   ;;  %s341_s14 = int_to_ptr.vmem [resolvable:$true] %s340_s14 }
  0x16   : > { %p1368_p11 = pneg %p307_p10  ;;  %s1571_s16 = smov 8  }
  0x17   : > { %372 = sbr.rel (%p307_p10) target bundleno = 1206 (0x4b6), region = 60 }
  0x18   : > { %p1369_p12 = pnand %p1379_p9, %p1368_p11 }
  0x19   : > { %s338_s12 = sshll.u32 %s2311_s9, 4  ;;  %s339_s12 = int_to_ptr.hbm [resolvable:$true] %s338_s12 }
  0x1a   : > { %1371 = dma.hbm_to_vmem [thread:$0]  (!%p1369_p12), %s339_s12, 2048, %s341_s14, [#allocation3], %s1570_s15, %s1570_s15, %s1571_s16  }
  0x1c   : > { %1542 = dma.done.wait (%p1379_p9), [#allocation3], 2048  }
  0x1d   : > { %1544 = vsyncadd (%p1379_p9), [#allocation3], 4294965248  ;;  %s2312_s2 = sld [smem:[#allocation14_spill]]  ;;  %p422_p13 = scmp.lt.s32.totalorder %s1655_s21, 1  ;;  %v477_v21 = vld [vmem:[%s2297_s7] sm:$0xff]  ;;  %vm478_vm1 = vcmask 64512  }
  0x1e   : > { %s2313_s0 = sld [smem:[#allocation13_spill]]  ;;  %v502_v22 = vld [vmem:[%s2297_s7 + $0x8] sm:$0xff]  ;;  %v579_v24 = vld [vmem:[%s2293_s3 + $0xf8] sm:$0xff]  ;;  %v578_v25 = vld [vmem:[%s2293_s3 + $0xf0] sm:$0xff]  ;;  %vm681_vm3 = vcmask 523264   ;;  %vm861_vm4 = vcmask 130048  }
  0x1f   : > { %s423_s25 = scalar_select %p422_p13, %s1655_s21, 1  ;;  %v541_v26 = vld [vmem:[%s2293_s3 + $0x78] sm:$0xff]  ;;  %v540_v27 = vld [vmem:[%s2293_s3 + $0x70] sm:$0xff]  ;;  %v577_v30 = vld [vmem:[%s2293_s3 + $0xe8] sm:$0xff] }
  0x20   : > { %542 = vmatpush.msra.mxu3 %v541_v26  ;;  %v616_v28 = vld [vmem:[%s2293_s3 + $0x178] sm:$0xff]  ;;  %v615_v29 = vld [vmem:[%s2293_s3 + $0x170] sm:$0xff]  ;;  %v539_v31 = vld [vmem:[%s2293_s3 + $0x68] sm:$0xff]  ;;  %s1358_s16 = sshll.u32 %s1655_s21, 4 }
  0x21   : > { %s1327_s14 = sshll.u32 %s423_s25, 3  ;;  %617 = vmatpush.msra.mxu2 %v616_v28  ;;  %v614_v32 = vld [vmem:[%s2293_s3 + $0x168] sm:$0xff]  ;;  %v576_v33 = vld [vmem:[%s2293_s3 + $0xe0] sm:$0xff]  ;;  %v575_v36 = vld [vmem:[%s2293_s3 + $0xd8] sm:$0xff]  ;;  %s1179_s30 = scalar_lea.hbm %s2300_s10, %s1358_s16 }
  0x22   : > { %543 = vmatpush.msra.mxu3 %v540_v27  ;;  %v538_v34 = vld [vmem:[%s2293_s3 + $0x60] sm:$0xff]  ;;  %v537_v37 = vld [vmem:[%s2293_s3 + $0x58] sm:$0xff]  ;;  %v574_v39 = vld [vmem:[%s2293_s3 + $0xd0] sm:$0xff]  ;;  %s1182_s25 = sshll.u32 %s1179_s30, 4  ;;  %s1183_s25 = int_to_ptr.hbm [resolvable:$true] %s1182_s25 }
  0x23   : > { %v450_v0 = vld [vmem:[%s2312_s2 + $0x78] sm:$0xff]  ;;  %v449_v1 = vld [vmem:[%s2312_s2 + $0x70] sm:$0xff]  ;;  %v448_v2 = vld [vmem:[%s2312_s2 + $0x68] sm:$0xff]  ;;  %618 = vmatpush.msra.mxu2 %v615_v29  ;;  %s1483_s9 = sshra.s32 %s1183_s25, 4  ;;  %s1484_s9 = int_to_ptr.hbm [resolvable:$true] %s1483_s9 }
  0x24   : > { %453 = vmatpush.msra.mxu0 %v450_v0  ;;  %v447_v3 = vld [vmem:[%s2312_s2 + $0x60] sm:$0xff]  ;;  %v446_v4 = vld [vmem:[%s2312_s2 + $0x58] sm:$0xff]  ;;  %v445_v5 = vld [vmem:[%s2312_s2 + $0x50] sm:$0xff]  ;;  %s425_s29 = scalar_lea.vmem %s2313_s0, %s1327_s14  ;;  %544 = vmatpush.msra.mxu3 %v539_v31  ;;  %s1485_s26 = scalar_lea.hbm %s1484_s9, 16 }
  0x25   : > { %v444_v6 = vld [vmem:[%s2312_s2 + $0x48] sm:$0xff]  ;;  %v443_v7 = vld [vmem:[%s2312_s2 + $0x40] sm:$0xff]  ;;  %v442_v8 = vld [vmem:[%s2312_s2 + $0x38] sm:$0xff]  ;;  %619 = vmatpush.msra.mxu2 %v614_v32  ;;  %p1486_p0 = scmp.ne.s32.totalorder %s1484_s9, %s1485_s26  ;;  %p1490_p3 = scmp.lt.s32.totalorder %s1484_s9, %s2300_s10 }
  0x26   : > { %454 = vmatpush.msra.mxu0 %v449_v1  ;;  %v441_v9 = vld [vmem:[%s2312_s2 + $0x30] sm:$0xff]  ;;  %v440_v10 = vld [vmem:[%s2312_s2 + $0x28] sm:$0xff]  ;;  %v439_v11 = vld [vmem:[%s2312_s2 + $0x20] sm:$0xff]  ;;  %545 = vmatpush.msra.mxu3 %v538_v34 }
  0x27   : > { %v438_v12 = vld [vmem:[%s2312_s2 + $0x18] sm:$0xff]  ;;  %v437_v13 = vld [vmem:[%s2312_s2 + $0x10] sm:$0xff]  ;;  %v436_v14 = vld [vmem:[%s2312_s2 + $0x8] sm:$0xff]  ;;  %p1487_p1 = pnand %p1486_p0, %p1672_p5 }
  0x28   : > { %455 = vmatpush.msra.mxu0 %v448_v2  ;;  %v435_v15 = vld [vmem:[%s2312_s2] sm:$0xff]  ;;  %v612_v38 = vld [vmem:[%s2293_s3 + $0x158] sm:$0xff]  ;;  %v536_v40 = vld [vmem:[%s2293_s3 + $0x50] sm:$0xff]  ;;  %546 = vmatpush.msra.mxu3 %v537_v37 }
  0x29   : > { %v434_v16 = vld [vmem:[%s425_s29] sm:$0xff]  ;;  %v611_v41 = vld [vmem:[%s2293_s3 + $0x150] sm:$0xff]  ;;  %v573_v42 = vld [vmem:[%s2293_s3 + $0xc8] sm:$0xff]  ;;  %s2074_s29 = sand.u32 1, %s1559_s18   ;;  %p1488_p2 = pneg %p1487_p1 }
  0x2a   : > { %456 = vmatpush.msra.mxu0 %v447_v3  ;;  %v1419_v17 = vld [vmem:[%s2312_s2 + $0x80] ss:$0 sm:$0xff]  ;;  %v535_v43 = vld [vmem:[%s2293_s3 + $0x48] sm:$0xff]  ;;  %547 = vmatpush.msra.mxu3 %v536_v40  ;;  %v571_v48 = vld [vmem:[%s2293_s3 + $0xb8] sm:$0xff]  ;;  %s2303_s13 = sshll.u32 %s2074_s29, 4  ;;  %s1163_s12 = scalar_lea.sflag [#allocation4], %s2074_s29 }
  0x2b   : > { %v613_v35 = vld [vmem:[%s2293_s3 + $0x160] sm:$0xff]  ;;  %v610_v44 = vld [vmem:[%s2293_s3 + $0x148] sm:$0xff]  ;;  %v533_v49 = vld [vmem:[%s2293_s3 + $0x38] sm:$0xff]  ;;  %s2088_s14 = scalar_lea.vmem [#allocation5], %s2303_s13 }
  0x2c   : > { %457 = vmatpush.msra.mxu0 %v446_v4  ;;  %620 = vmatpush.msra.mxu2 %v613_v35  ;;  %v572_v45 = vld [vmem:[%s2293_s3 + $0xc0] sm:$0xff]  ;;  %v608_v50 = vld [vmem:[%s2293_s3 + $0x138] sm:$0xff]  ;;  %v570_v51 = vld [vmem:[%s2293_s3 + $0xb0] sm:$0xff]  ;;  %s1180_s15 = sshll.u32 %s2088_s14, 4  ;;  %s1181_s15 = int_to_ptr.vmem [resolvable:$true] %s1180_s15 }
  0x2d   : > { %v534_v46 = vld [vmem:[%s2293_s3 + $0x40] sm:$0xff]  ;;  %548 = vmatpush.msra.mxu3 %v535_v43  ;;  %v532_v52 = vld [vmem:[%s2293_s3 + $0x30] sm:$0xff]  ;;  %v569_v54 = vld [vmem:[%s2293_s3 + $0xa8] sm:$0xff] }
  0x2e   : > { %458 = vmatpush.msra.mxu0 %v445_v5  ;;  %621 = vmatpush.msra.mxu2 %v612_v38  ;;  %v609_v47 = vld [vmem:[%s2293_s3 + $0x140] sm:$0xff]  ;;  %v607_v53 = vld [vmem:[%s2293_s3 + $0x130] sm:$0xff]  ;;  %v531_v55 = vld [vmem:[%s2293_s3 + $0x28] sm:$0xff] }
  0x2f   : > { %549 = vmatpush.msra.mxu3 %v534_v46  ;;  %v606_v56 = vld [vmem:[%s2293_s3 + $0x128] sm:$0xff]  ;;  %v568_v57 = vld [vmem:[%s2293_s3 + $0xa0] sm:$0xff]  ;;  %v567_v60 = vld [vmem:[%s2293_s3 + $0x98] sm:$0xff] }
  0x30   : > { %459 = vmatpush.msra.mxu0 %v444_v6  ;;  %622 = vmatpush.msra.mxu2 %v611_v41  ;;  %v530_v58 = vld [vmem:[%s2293_s3 + $0x20] sm:$0xff]  ;;  %v529_v61 = vld [vmem:[%s2293_s3 + $0x18] sm:$0xff]  ;;  %v566_v63 = vld [vmem:[%s2293_s3 + $0x90] sm:$0xff] }
  0x31   : > { %550 = vmatpush.msra.mxu3 %v533_v49  ;;  %v605_v59 = vld [vmem:[%s2293_s3 + $0x120] sm:$0xff]  ;;  %v604_v62 = vld [vmem:[%s2293_s3 + $0x118] sm:$0xff]  ;;  %v528_v0 = vld [vmem:[%s2293_s3 + $0x10] sm:$0xff] }
  0x32   : > { %460 = vmatpush.msra.mxu0 %v443_v7  ;;  %623 = vmatpush.msra.mxu2 %v610_v44  ;;  %v565_v1 = vld [vmem:[%s2293_s3 + $0x88] sm:$0xff]  ;;  %v564_v3 = vld [vmem:[%s2293_s3 + $0x80] sm:$0xff]  ;;  %v603_v5 = vld [vmem:[%s2293_s3 + $0x110] sm:$0xff] }
  0x33   : > { %551 = vmatpush.msra.mxu3 %v532_v52  ;;  %v527_v2 = vld [vmem:[%s2293_s3 + $0x8] sm:$0xff]  ;;  %v526_v4 = vld [vmem:[%s2293_s3] sm:$0xff]  ;;  %v676_v29 = vld [vmem:[%s2294_s4 + $0x18] sm:$0xff] }
  0x34   : > { %461 = vmatpush.msra.mxu0 %v442_v8  ;;  %624 = vmatpush.msra.mxu2 %v609_v47  ;;  %v602_v6 = vld [vmem:[%s2293_s3 + $0x108] sm:$0xff]  ;;  %v601_v7 = vld [vmem:[%s2293_s3 + $0x100] sm:$0xff]  ;;  %v675_v31 = vld [vmem:[%s2294_s4 + $0x10] sm:$0xff] }
  0x35   : > { %552 = vmatpush.msra.mxu3 %v531_v55  ;;  %v677_v27 = vld [vmem:[%s2294_s4 + $0x20] sm:$0xff]  ;;  %v747_v32 = vld [vmem:[%s2294_s4 + $0x50] sm:$0xff]  ;;  %v643_v34 = vld [vmem:[%s2296_s6 + $0x8] sm:$0xff] }
  0x36   : > { %462 = vmatpush.msra.mxu0 %v441_v9  ;;  %625 = vmatpush.msra.mxu2 %v608_v50  ;;  %v749_v28 = vld [vmem:[%s2294_s4 + $0x60] sm:$0xff]  ;;  %v715_v35 = vld [vmem:[%s2296_s6 + $0x18] sm:$0xff]  ;;  %v785_v37 = vld [vmem:[%s2296_s6 + $0x28] sm:$0xff] }
  0x37   : > { %553 = vmatpush.msra.mxu3 %v530_v58  ;;  %v673_v38 = vld [vmem:[%s2294_s4] sm:$0xff]  ;;  %v822_v41 = vld [vmem:[%s2294_s4 + $0xb8] sm:$0xff]  ;;  %v820_v43 = vld [vmem:[%s2294_s4 + $0xa8] sm:$0xff] }
  0x38   : > { %463 = vmatpush.msra.mxu0 %v440_v10  ;;  %626 = vmatpush.msra.mxu2 %v607_v53  ;;  %v1420_v10 = vld [vmem:[%s2293_s3 + $0x180] ss:$0 sm:$0xff]  ;;  %v817_v46 = vld [vmem:[%s2294_s4 + $0x90] sm:$0xff]  ;;  %v816_v47 = vld [vmem:[%s2294_s4 + $0x88] sm:$0xff] }
  0x39   : > { %554 = vmatpush.msra.mxu3 %v529_v61  ;;  %v745_v40 = vld [vmem:[%s2294_s4 + $0x40] sm:$0xff]  ;;  %v979_v49 = vld [vmem:[%s2295_s5 + $0xf8] sm:$0xff]  ;;  %v978_v50 = vld [vmem:[%s2295_s5 + $0xf0] sm:$0xff] }
  0x3a   : > { %464 = vmatpush.msra.mxu0 %v439_v11  ;;  %627 = vmatpush.msra.mxu2 %v606_v56  ;;  %v819_v44 = vld [vmem:[%s2294_s4 + $0xa0] sm:$0xff]  ;;  %v975_v53 = vld [vmem:[%s2295_s5 + $0xd8] sm:$0xff]  ;;  %v974_v56 = vld [vmem:[%s2295_s5 + $0xd0] sm:$0xff] }
  0x3b   : > { %555 = vmatpush.msra.mxu3 %v528_v0  ;;  %v976_v52 = vld [vmem:[%s2295_s5 + $0xe0] sm:$0xff]  ;;  %v973_v61 = vld [vmem:[%s2295_s5 + $0xc8] sm:$0xff]  ;;  %v970_v0 = vld [vmem:[%s2295_s5 + $0xb0] sm:$0xff] }
  0x3c   : > { %465 = vmatpush.msra.mxu0 %v438_v12  ;;  %628 = vmatpush.msra.mxu2 %v605_v59 }
  0x3d   : > { %556 = vmatpush.msra.mxu3 %v527_v2  ;;  %v968_v2 = vld [vmem:[%s2295_s5 + $0xa0] sm:$0xff] }
  0x3e   : > { %466 = vmatpush.msra.mxu0 %v437_v13  ;;  %629 = vmatpush.msra.mxu2 %v604_v62  ;;  %v972_v62 = vld [vmem:[%s2295_s5 + $0xc0] sm:$0xff] }
  0x3f   : > { %557 = vmatpush.msra.mxu3 %v526_v4  ;;  %v966_v4 = vld [vmem:[%s2295_s5 + $0x90] sm:$0xff] }
  0x40   : > { %467 = vmatpush.msra.mxu0 %v436_v14  ;;  %630 = vmatpush.msra.mxu2 %v603_v5  ;;  %v965_v5 = vld [vmem:[%s2295_s5 + $0x88] sm:$0xff] }
  0x42   : > { %468 = vmatpush.msra.mxu0 %v435_v15  ;;  %631 = vmatpush.msra.mxu2 %v602_v6  ;;  %v964_v6 = vld [vmem:[%s2295_s5 + $0x80] sm:$0xff] }
  0x43   : > { %469 = vmatmul.f32.vlgmr.msra.gmra.mxu0 %v434_v16  ;;  %v680_v16 = vld [vmem:[%s2294_s4 + $0x38] sm:$0xff] }
  0x44   : > { %632 = vmatpush.msra.mxu2 %v601_v7  ;;  %696 = vmatpush.msrb.mxu3 %v680_v16 }
  0xc0   : > { %v470_v18 = vpop.f32.mrf.mxu0 }
  0xc1   : > { %v471_v19 = vadd.f32 %v1419_v17, %v470_v18  ;;  %v679_v17 = vld [vmem:[%s2294_s4 + $0x30] sm:$0xff]  ;;  %v752_v18 = vld [vmem:[%s2294_s4 + $0x78] sm:$0xff] }
  0xc2   : > { %767 = vmatpush.msrb.mxu2 %v752_v18  ;;  %697 = vmatpush.msrb.mxu3 %v679_v17  ;;  %v934_v18 = vld [vmem:[%s2295_s5 + $0x60] sm:$0xff] }
  0xc3   : > { %v474_v20 = vmul.f32 0.2, %v471_v19  ;;  %vm473_vm0 = vcmp.ge.f32.partialorder %v471_v19, 0.0 }
  0xc5   : > { %v1754_v23 = vsel %vm473_vm0, %v471_v19, %v474_v20  ;;  %v751_v19 = vld [vmem:[%s2294_s4 + $0x70] sm:$0xff] }
  0xc6   : > { %497 = vmatpush.msra.mxu1 %v1754_v23  ;;  %521 = vmatpush.msrb.mxu0 %v1754_v23 }
  0xc7   : > { %1330 = vmatmul.msk.f32.vlgmr.msra.gmra.mxu1 %vm478_vm1, %v477_v21  ;;  %1331 = vmatmul.msk.f32.vlgmr.msrb.gmra.mxu0 %vm478_vm1, %v502_v22  ;;  %v678_v21 = vld [vmem:[%s2294_s4 + $0x28] sm:$0xff] }
  0xc8   : > { %580 = vmatpush.msrb.mxu1 %v579_v24  ;;  %v750_v22 = vld [vmem:[%s2294_s4 + $0x68] sm:$0xff]  ;;  %768 = vmatpush.msrb.mxu2 %v751_v19  ;;  %v642_v24 = vld [vmem:[%s2296_s6] sm:$0xff] }
  0xc9   : > { %698 = vmatpush.msrb.mxu3 %v678_v21 }
  0xca   : > { %581 = vmatpush.msrb.mxu1 %v578_v25  ;;  %v714_v25 = vld [vmem:[%s2296_s6 + $0x10] sm:$0xff]  ;;  %769 = vmatpush.msrb.mxu2 %v750_v22 }
  0xcb   : > { %699 = vmatpush.msrb.mxu3 %v677_v27  ;;  %v932_v22 = vld [vmem:[%s2295_s5 + $0x50] sm:$0xff] }
  0xcc   : > { %582 = vmatpush.msrb.mxu1 %v577_v30  ;;  %v748_v30 = vld [vmem:[%s2294_s4 + $0x58] sm:$0xff]  ;;  %770 = vmatpush.msrb.mxu2 %v749_v28 }
  0xcd   : > { %700 = vmatpush.msrb.mxu3 %v676_v29  ;;  %v859_v29 = vld [vmem:[%s2298_s8] sm:$0xff] }
  0xce   : > { %583 = vmatpush.msrb.mxu1 %v576_v33  ;;  %771 = vmatpush.msrb.mxu2 %v748_v30  ;;  %v674_v33 = vld [vmem:[%s2294_s4 + $0x8] sm:$0xff]  ;;  %v891_v30 = vld [vmem:[%s2298_s8 + $0x10] sm:$0xff] }
  0xcf   : > { %701 = vmatpush.msrb.mxu3 %v675_v31  ;;  %v1020_v31 = vld [vmem:[%s2295_s5 + $0x178] sm:$0xff] }
  0xd0   : > { %584 = vmatpush.msrb.mxu1 %v575_v36  ;;  %772 = vmatpush.msrb.mxu2 %v747_v32  ;;  %v784_v36 = vld [vmem:[%s2296_s6 + $0x20] sm:$0xff]  ;;  %v1019_v32 = vld [vmem:[%s2295_s5 + $0x170] sm:$0xff] }
  0xd1   : > { %702 = vmatpush.msrb.mxu3 %v674_v33  ;;  %v1018_v33 = vld [vmem:[%s2295_s5 + $0x168] sm:$0xff] }
  0xd2   : > { %585 = vmatpush.msrb.mxu1 %v574_v39  ;;  %v746_v39 = vld [vmem:[%s2294_s4 + $0x48] sm:$0xff] }
  0xd3   : > { %703 = vmatpush.msrb.mxu3 %v673_v38  ;;  %773 = vmatpush.msrb.mxu2 %v746_v39  ;;  %v1015_v38 = vld [vmem:[%s2295_s5 + $0x150] sm:$0xff]  ;;  %v1014_v39 = vld [vmem:[%s2295_s5 + $0x148] sm:$0xff] }
  0xd4   : > { %586 = vmatpush.msrb.mxu1 %v573_v42  ;;  %v821_v42 = vld [vmem:[%s2294_s4 + $0xb0] sm:$0xff] }
  0xd5   : > { %774 = vmatpush.msrb.mxu2 %v745_v40  ;;  %v930_v40 = vld [vmem:[%s2295_s5 + $0x40] sm:$0xff] }
  0xd6   : > { %587 = vmatpush.msrb.mxu1 %v572_v45  ;;  %v818_v45 = vld [vmem:[%s2294_s4 + $0x98] sm:$0xff] }
  0xd8   : > { %588 = vmatpush.msrb.mxu1 %v571_v48  ;;  %v815_v48 = vld [vmem:[%s2294_s4 + $0x80] sm:$0xff] }
  0xda   : > { %589 = vmatpush.msrb.mxu1 %v570_v51  ;;  %v977_v51 = vld [vmem:[%s2295_s5 + $0xe8] sm:$0xff] }
  0xdc   : > { %590 = vmatpush.msrb.mxu1 %v569_v54 }
  0xde   : > { %591 = vmatpush.msrb.mxu1 %v568_v57 }
  0xe0   : > { %592 = vmatpush.msrb.mxu1 %v567_v60 }
  0xe2   : > { %593 = vmatpush.msrb.mxu1 %v566_v63  ;;  %v971_v63 = vld [vmem:[%s2295_s5 + $0xb8] sm:$0xff] }
  0xe4   : > { %594 = vmatpush.msrb.mxu1 %v565_v1  ;;  %v969_v1 = vld [vmem:[%s2295_s5 + $0xa8] sm:$0xff] }
  0xe6   : > { %595 = vmatpush.msrb.mxu1 %v564_v3  ;;  %v967_v3 = vld [vmem:[%s2295_s5 + $0x98] sm:$0xff] }
  0xe7   : > { %596 = vmatmul.f32.vlgmr.msrb.gmra.mxu1 %v1754_v23 }
 0x144   : > { %v499_v8 = vpop.f32.mrf.mxu1  ;;  %v523_v9 = vpop.f32.mrf.mxu0 }
 0x145   : > { %558 = vmatmul.f32.vlgmr.msra.gmra.mxu3 %v499_v8  ;;  %633 = vmatmul.f32.vlgmr.msra.gmra.mxu2 %v523_v9  ;;  %v1421_v8 = vld [vmem:[%s2294_s4 + $0xc0] ss:$0 sm:$0xff] }
 0x164   : > { %v597_v13 = vpop.f32.mrf.mxu1 }
 0x1c8   : > { %v559_v11 = vpop.f32.mrf.mxu3  ;;  %v634_v14 = vpop.f32.mrf.mxu2 }
 0x1c9   : > { %v563_v12 = vadd.f32 %v1420_v10, %v559_v11  ;;  %v937_v11 = vld [vmem:[%s2295_s5 + $0x78] sm:$0xff] }
 0x1cb   : > { %v600_v15 = vadd.f32 %v597_v13, %v563_v12  ;;  %v936_v12 = vld [vmem:[%s2295_s5 + $0x70] sm:$0xff] }
 0x1cd   : > { %v637_v20 = vadd.f32 %v634_v14, %v600_v15  ;;  %v935_v14 = vld [vmem:[%s2295_s5 + $0x68] sm:$0xff] }
 0x1cf   : > { %vm638_vm2 = vcmp.ge.f32.partialorder %v637_v20, 0.0  ;;  %v639_v23 = vmul.f32 0.2, %v637_v20 }
 0x1d1   : > { %v640_v26 = vsel %vm638_vm2, %v637_v20, %v639_v23  ;;  %v933_v20 = vld [vmem:[%s2295_s5 + $0x58] sm:$0xff] }
 0x1d2   : > { %665 = vmatpush.msra.mxu0 %v640_v26  ;;  %737 = vmatpush.msra.mxu1 %v640_v26 }
 0x1d3   : > { %1332 = vmatmul.msk.f32.vlgmr.msra.gmra.mxu0 %vm478_vm1, %v642_v24  ;;  %1336 = vmatmul.msk.f32.vlgmr.msra.gmra.mxu1 %vm478_vm1, %v714_v25  ;;  %v931_v24 = vld [vmem:[%s2295_s5 + $0x48] sm:$0xff] }
 0x1d4   : > { %807 = vmatpush.msrb.mxu0 %v640_v26  ;;  %837 = vmatpush.msrb.mxu1 %v822_v41  ;;  %v1013_v41 = vld [vmem:[%s2295_s5 + $0x140] sm:$0xff] }
 0x1d6   : > { %838 = vmatpush.msrb.mxu1 %v821_v42  ;;  %938 = vmatpush.msra.mxu0 %v937_v11  ;;  %v929_v42 = vld [vmem:[%s2295_s5 + $0x38] sm:$0xff] }
 0x1d8   : > { %839 = vmatpush.msrb.mxu1 %v820_v43  ;;  %939 = vmatpush.msra.mxu0 %v936_v12  ;;  %v1012_v43 = vld [vmem:[%s2295_s5 + $0x138] sm:$0xff]  ;;  %v1109_v12 = vld [vmem:[#allocation2 + $0x20] sm:$0xff] }
 0x1da   : > { %840 = vmatpush.msrb.mxu1 %v819_v44  ;;  %940 = vmatpush.msra.mxu0 %v935_v14  ;;  %v928_v44 = vld [vmem:[%s2295_s5 + $0x30] sm:$0xff]  ;;  %v1108_v14 = vld [vmem:[#allocation2 + $0x18] sm:$0xff] }
 0x1db   : > { %1333 = vmatmul.msk.f32.gmra.mxu0 %vm478_vm1, %v643_v34  ;;  %1337 = vmatmul.msk.f32.gmra.mxu1 %vm478_vm1, %v715_v35  ;;  %v1017_v34 = vld [vmem:[%s2295_s5 + $0x160] sm:$0xff]  ;;  %v860_v35 = vld [vmem:[%s2298_s8 + $0x8] sm:$0xff] }
 0x1dc   : > { %841 = vmatpush.msrb.mxu1 %v818_v45  ;;  %941 = vmatpush.msra.mxu0 %v934_v18  ;;  %v1011_v45 = vld [vmem:[%s2295_s5 + $0x130] sm:$0xff] }
 0x1de   : > { %842 = vmatpush.msrb.mxu1 %v817_v46  ;;  %942 = vmatpush.msra.mxu0 %v933_v20  ;;  %v927_v46 = vld [vmem:[%s2295_s5 + $0x28] sm:$0xff] }
 0x1e0   : > { %843 = vmatpush.msrb.mxu1 %v816_v47  ;;  %943 = vmatpush.msra.mxu0 %v932_v22  ;;  %v1010_v47 = vld [vmem:[%s2295_s5 + $0x128] sm:$0xff] }
 0x1e2   : > { %844 = vmatpush.msrb.mxu1 %v815_v48  ;;  %944 = vmatpush.msra.mxu0 %v931_v24  ;;  %v926_v48 = vld [vmem:[%s2295_s5 + $0x20] sm:$0xff] }
 0x1e3   : > { %1340 = vmatmul.msk.f32.vlgmr.msrb.gmra.mxu0 %vm478_vm1, %v784_v36  ;;  %v892_v36 = vld [vmem:[%s2298_s8 + $0x18] sm:$0xff] }
 0x1e4   : > { %980 = vmatpush.msra.mxu1 %v979_v49  ;;  %945 = vmatpush.msra.mxu0 %v930_v40  ;;  %v1009_v49 = vld [vmem:[%s2295_s5 + $0x120] sm:$0xff] }
 0x1e6   : > { %981 = vmatpush.msra.mxu1 %v978_v50  ;;  %946 = vmatpush.msra.mxu0 %v929_v42  ;;  %v925_v50 = vld [vmem:[%s2295_s5 + $0x18] sm:$0xff] }
 0x1e8   : > { %982 = vmatpush.msra.mxu1 %v977_v51  ;;  %947 = vmatpush.msra.mxu0 %v928_v44  ;;  %v1008_v51 = vld [vmem:[%s2295_s5 + $0x118] sm:$0xff] }
 0x1ea   : > { %983 = vmatpush.msra.mxu1 %v976_v52  ;;  %948 = vmatpush.msra.mxu0 %v927_v46  ;;  %v924_v52 = vld [vmem:[%s2295_s5 + $0x10] sm:$0xff] }
 0x1eb   : > { %1341 = vmatmul.msk.f32.gmra.mxu0 %vm478_vm1, %v785_v37  ;;  %v1016_v37 = vld [vmem:[%s2295_s5 + $0x158] sm:$0xff] }
 0x1ec   : > { %984 = vmatpush.msra.mxu1 %v975_v53  ;;  %949 = vmatpush.msra.mxu0 %v926_v48  ;;  %v1007_v53 = vld [vmem:[%s2295_s5 + $0x110] sm:$0xff] }
 0x1ee   : > { %985 = vmatpush.msra.mxu1 %v974_v56  ;;  %950 = vmatpush.msra.mxu0 %v925_v50  ;;  %v922_v56 = vld [vmem:[%s2295_s5] sm:$0xff] }
 0x1f0   : > { %986 = vmatpush.msra.mxu1 %v973_v61  ;;  %951 = vmatpush.msra.mxu0 %v924_v52 }
 0x1f2   : > { %987 = vmatpush.msra.mxu1 %v972_v62  ;;  %v1120_v62 = vld [vmem:[#allocation2 + $0x78] sm:$0xff] }
 0x1f4   : > { %988 = vmatpush.msra.mxu1 %v971_v63  ;;  %v1119_v63 = vld [vmem:[#allocation2 + $0x70] sm:$0xff] }
 0x1f6   : > { %989 = vmatpush.msra.mxu1 %v970_v0  ;;  %v1118_v0 = vld [vmem:[#allocation2 + $0x68] sm:$0xff] }
 0x1f8   : > { %990 = vmatpush.msra.mxu1 %v969_v1  ;;  %v1117_v1 = vld [vmem:[#allocation2 + $0x60] sm:$0xff] }
 0x1fa   : > { %991 = vmatpush.msra.mxu1 %v968_v2  ;;  %v1116_v2 = vld [vmem:[#allocation2 + $0x58] sm:$0xff] }
 0x1fc   : > { %992 = vmatpush.msra.mxu1 %v967_v3  ;;  %v1115_v3 = vld [vmem:[#allocation2 + $0x50] sm:$0xff] }
 0x1fe   : > { %993 = vmatpush.msra.mxu1 %v966_v4  ;;  %v1114_v4 = vld [vmem:[#allocation2 + $0x48] sm:$0xff] }
 0x200   : > { %994 = vmatpush.msra.mxu1 %v965_v5  ;;  %v1113_v5 = vld [vmem:[#allocation2 + $0x40] sm:$0xff] }
 0x202   : > { %995 = vmatpush.msra.mxu1 %v964_v6  ;;  %v1422_v6 = vld [vmem:[%s2295_s5 + $0x180] ss:$0 sm:$0xff] }
 0x250   : > { %v667_v54 = vpop.f32.mrf.mxu0  ;;  %v739_v55 = vpop.f32.mrf.mxu1 }
 0x251   : > { %1334 = vmatmul.msk.f32.vlgmr.msrb.gmra.mxu3 %vm681_vm3, %v667_v54  ;;  %1338 = vmatmul.msk.f32.vlgmr.msrb.gmra.mxu2 %vm681_vm3, %v739_v55  ;;  %v923_v54 = vld [vmem:[%s2295_s5 + $0x8] sm:$0xff] }
 0x252   : > { %v1006_v55 = vld [vmem:[%s2295_s5 + $0x108] sm:$0xff]  ;;  %952 = vmatpush.msra.mxu0 %v923_v54 }
 0x254   : > { %953 = vmatpush.msra.mxu0 %v922_v56 }
 0x258   : > { %v670_v57 = vpop.f32.mrf.mxu0  ;;  %v742_v58 = vpop.f32.mrf.mxu1 }
 0x259   : > { %1335 = vmatmul.msk.f32.gmra.mxu3 %vm681_vm3, %v670_v57  ;;  %1339 = vmatmul.msk.f32.gmra.mxu2 %vm681_vm3, %v742_v58  ;;  %v1005_v57 = vld [vmem:[%s2295_s5 + $0x100] sm:$0xff] }
 0x260   : > { %v809_v59 = vpop.f32.mrf.mxu0 }
 0x261   : > { %1342 = vmatmul.msk.f32.vlgmr.msrb.gmra.mxu1 %vm681_vm3, %v809_v59 }
 0x268   : > { %v812_v60 = vpop.f32.mrf.mxu0 }
 0x269   : > { %1343 = vmatmul.msk.f32.gmra.mxu1 %vm681_vm3, %v812_v60 }
 0x2d4   : > { %v705_v7 = vpop.f32.mrf.mxu3  ;;  %v776_v9 = vpop.f32.mrf.mxu2 }
 0x2d5   : > { %v712_v10 = vadd.f32 %v1421_v8, %v705_v7  ;;  %v1112_v7 = vld [vmem:[#allocation2 + $0x38] sm:$0xff] }
 0x2d7   : > { %v782_v13 = vadd.f32 %v776_v9, %v712_v10  ;;  %v1110_v10 = vld [vmem:[#allocation2 + $0x28] sm:$0xff] }
 0x2dc   : > { %v708_v15 = vpop.f32.mrf.mxu3  ;;  %v779_v21 = vpop.f32.mrf.mxu2 }
 0x2dd   : > { %v713_v19 = vadd.f32 %v1421_v8, %v708_v15  ;;  %v1111_v8 = vld [vmem:[#allocation2 + $0x30] sm:$0xff] }
 0x2de   : > { %v846_v16 = vpop.f32.mrf.mxu1 }
 0x2df   : > { %v852_v17 = vadd.f32 %v846_v16, %v782_v13  ;;  %v783_v23 = vadd.f32 %v779_v21, %v713_v19  ;;  %v1107_v16 = vld [vmem:[#allocation2 + $0x10] sm:$0xff]  ;;  %v1106_v19 = vld [vmem:[#allocation2 + $0x8] sm:$0xff] }
 0x2e1   : > { %1423 = vtanh.f32 %v852_v17 }
 0x2e6   : > { %v849_v25 = vpop.f32.mrf.mxu1 }
 0x2e7   : > { %v1424_v26 = vpop.eup %1423  ;;  %v853_v27 = vadd.f32 %v849_v25, %v783_v23  ;;  %v1105_v23 = vld [vmem:[#allocation2] sm:$0xff] }
 0x2e8   : > { %996 = vmatmul.f32.vlgmr.msra.gmra.mxu1 %v1424_v26  ;;  %856 = vst [vmem:[%s2088_s14] sm:$0xff] %v1424_v26 }
 0x2e9   : > { %1425 = vtanh.f32 %v853_v27 }
 0x2ef   : > { %v1426_v28 = vpop.eup %1425 }
 0x2f0   : > { %882 = vmatpush.msra.mxu3 %v1426_v28  ;;  %913 = vmatpush.msra.mxu2 %v1426_v28  ;;  %857 = vst [vmem:[%s2088_s14 + $0x8] sm:$0xff] %v1426_v28  ;;  %s1489_s14 = scalar_lea.hbm %s2300_s10, 32 }
 0x2f1   : > { %999 = vmatmul.f32.gmra.mxu1 %v1426_v28  ;;  %p1491_p4 = scmp.lt.s32.totalorder %s1489_s14, %s1485_s26 }
 0x2f2   : > { %883 = vmatpush.msra.mxu3 %v1424_v26  ;;  %914 = vmatpush.msra.mxu2 %v1424_v26 }
 0x2f3   : > { %1344 = vmatmul.msk.f32.vlgmr.msra.gmra.mxu3 %vm861_vm4, %v859_v29  ;;  %1346 = vmatmul.msk.f32.vlgmr.msra.gmra.mxu2 %vm861_vm4, %v891_v30  ;;  %p1492_p7 = por %p1491_p4, %p1490_p3 }
 0x2f4   : > { %1021 = vmatpush.msrb.mxu3 %v1020_v31  ;;  %1121 = vmatpush.msrb.mxu2 %v1120_v62 }
 0x2f5   : > { %p1493_p8 = pnand %p1492_p7, %p1488_p2 }
 0x2f6   : > { %1022 = vmatpush.msrb.mxu3 %v1019_v32  ;;  %1122 = vmatpush.msrb.mxu2 %v1119_v63 }
 0x2f8   : > { %1023 = vmatpush.msrb.mxu3 %v1018_v33  ;;  %1123 = vmatpush.msrb.mxu2 %v1118_v0 }
 0x2fa   : > { %1024 = vmatpush.msrb.mxu3 %v1017_v34  ;;  %1124 = vmatpush.msrb.mxu2 %v1117_v1 }
 0x2fb   : > { %1345 = vmatmul.msk.f32.gmra.mxu3 %vm861_vm4, %v860_v35  ;;  %1347 = vmatmul.msk.f32.gmra.mxu2 %vm861_vm4, %v892_v36 }
 0x2fc   : > { %1025 = vmatpush.msrb.mxu3 %v1016_v37  ;;  %1125 = vmatpush.msrb.mxu2 %v1116_v2 }
 0x2fe   : > { %1026 = vmatpush.msrb.mxu3 %v1015_v38  ;;  %1126 = vmatpush.msrb.mxu2 %v1115_v3  ;;  %v1046_v38 = vlaneseq }
 0x300   : > { %1027 = vmatpush.msrb.mxu3 %v1014_v39  ;;  %1127 = vmatpush.msrb.mxu2 %v1114_v4 }
 0x302   : > { %1028 = vmatpush.msrb.mxu3 %v1013_v41  ;;  %1128 = vmatpush.msrb.mxu2 %v1113_v5  ;;  %v2192_v41 = vand.u32 127, %v1046_v38 }
 0x304   : > { %1029 = vmatpush.msrb.mxu3 %v1012_v43  ;;  %1129 = vmatpush.msrb.mxu2 %v1112_v7  ;;  %vm1049_vm7 = vcmp.ge.s32.totalorder %v2192_v41, 48  ;;  %vm1050_vm8 = vcmp.lt.s32.totalorder %v2192_v41, 64 }
 0x305   : > { %vm2196_vm11 = vmand %vm1049_vm7, %vm1050_vm8 }
 0x306   : > { %1030 = vmatpush.msrb.mxu3 %v1011_v45  ;;  %1130 = vmatpush.msrb.mxu2 %v1111_v8 }
 0x308   : > { %1031 = vmatpush.msrb.mxu3 %v1010_v47  ;;  %1131 = vmatpush.msrb.mxu2 %v1110_v10 }
 0x30a   : > { %1032 = vmatpush.msrb.mxu3 %v1009_v49  ;;  %1132 = vmatpush.msrb.mxu2 %v1109_v12 }
 0x30c   : > { %1033 = vmatpush.msrb.mxu3 %v1008_v51  ;;  %1133 = vmatpush.msrb.mxu2 %v1108_v14 }
 0x30e   : > { %1034 = vmatpush.msrb.mxu3 %v1007_v53  ;;  %1134 = vmatpush.msrb.mxu2 %v1107_v16 }
 0x310   : > { %1035 = vmatpush.msrb.mxu3 %v1006_v55  ;;  %1135 = vmatpush.msrb.mxu2 %v1106_v19 }
 0x312   : > { %1036 = vmatpush.msrb.mxu3 %v1005_v57  ;;  %1136 = vmatpush.msrb.mxu2 %v1105_v23 }
 0x365   : > { %v997_v13 = vpop.f32.mrf.mxu1 }
 0x36e   : > { %v1000_v25 = vpop.f32.mrf.mxu1 }
 0x376   : > { %v885_v58 = vpop.f32.mrf.mxu3  ;;  %v916_v59 = vpop.f32.mrf.mxu2 }
 0x377   : > { %954 = vmatmul.f32.vlgmr.msra.gmra.mxu0 %v885_v58  ;;  %1037 = vmatmul.f32.vlgmr.msrb.gmra.mxu3 %v916_v59 }
 0x37e   : > { %v888_v60 = vpop.f32.mrf.mxu3  ;;  %v919_v61 = vpop.f32.mrf.mxu2 }
 0x37f   : > { %957 = vmatmul.f32.gmra.mxu0 %v888_v60  ;;  %1040 = vmatmul.f32.gmra.mxu3 %v919_v61 }
 0x3f4   : > { %v955_v9 = vpop.f32.mrf.mxu0 }
 0x3f5   : > { %v962_v11 = vadd.f32 %v1422_v6, %v955_v9 }
 0x3f7   : > { %v1003_v15 = vadd.f32 %v997_v13, %v962_v11 }
 0x3fa   : > { %v1038_v17 = vpop.f32.mrf.mxu3 }
 0x3fb   : > { %v2186_v18 = vadd.f32 %v1038_v17, %v1003_v15 }
 0x3fc   : > { %v958_v20 = vpop.f32.mrf.mxu0 }
 0x3fd   : > { %v1057_v21 = vand.u32 2147483647, %v2186_v18  ;;  %v963_v22 = vadd.f32 %v1422_v6, %v958_v20  ;;  %vm1065_vm12 = vcmp.ge.f32.partialorder %v2186_v18, 0.0 }
 0x3ff   : > { %v1059_v24 = vsub.f32 0.0, %v1057_v21  ;;  %v1004_v27 = vadd.f32 %v1000_v25, %v963_v22 }
 0x401   : > { %v1061_v26 = vmul.f32 1.442695, %v1059_v24 }
 0x402   : > { %v1041_v28 = vpop.f32.mrf.mxu3 }
 0x403   : > { %1427 = vpow2.f32 %v1061_v26  ;;  %v2189_v29 = vadd.f32 %v1041_v28, %v1004_v27 }
 0x405   : > { %v1058_v30 = vand.u32 2147483647, %v2189_v29  ;;  %vm1066_vm1 = vcmp.ge.f32.partialorder %v2189_v29, 0.0 }
 0x407   : > { %v1060_v31 = vsub.f32 0.0, %v1058_v30 }
 0x409   : > { %v1428_v32 = vpop.eup %1427  ;;  %v1063_v33 = vmul.f32 1.442695, %v1060_v31 }
 0x40a   : > { %v1067_v34 = vadd.f32 1.0, %v1428_v32 }
 0x40b   : > { %1429 = vpow2.f32 %v1063_v33 }
 0x40c   : > { %1431 = vrcp.f32 %v1067_v34  ;;  %v1080_v42 = vand.u32 2147483648, %v1067_v34  ;;  %v1078_v44 = vand.u32 2147483647, %v1067_v34  ;;  %vm1074_vm6 = vweird.f32 %v1067_v34 }
 0x40e   : > { %v1081_v47 = vor.u32 1.1754944e-38, %v1080_v42  ;;  %vm1079_vm10 = vcmp.eq.f32.partialorder %v1078_v44, 8.507059e+37 }
 0x411   : > { %v1430_v35 = vpop.eup %1429 }
 0x412   : > { %v1432_v36 = vpop.eup %1431  ;;  %v1068_v37 = vadd.f32 1.0, %v1430_v35 }
 0x413   : > { %v1070_v39 = vmul.f32 %v1432_v36, %v1067_v34  ;;  %vm1075_vm5 = vweird.f32 %v1432_v36 }
 0x414   : > { %1433 = vrcp.f32 %v1068_v37  ;;  %vm1076_vm9 = vmor %vm1074_vm6, %vm1075_vm5  ;;  %v1095_v54 = vand.u32 2147483648, %v1068_v37  ;;  %v1093_v57 = vand.u32 2147483647, %v1068_v37  ;;  %vm1089_vm14 = vweird.f32 %v1068_v37 }
 0x415   : > { %v1071_v40 = vsub.f32 1.0, %v1070_v39 }
 0x416   : > { %v1096_v59 = vor.u32 1.1754944e-38, %v1095_v54  ;;  %vm1094_vm0 = vcmp.eq.f32.partialorder %v1093_v57, 8.507059e+37 }
 0x417   : > { %v1072_v43 = vmul.f32 %v1432_v36, %v1071_v40 }
 0x419   : > { %v1073_v45 = vadd.f32 %v1432_v36, %v1072_v43 }
 0x41a   : > { %v1434_v46 = vpop.eup %1433 }
 0x41b   : > { %v1077_v48 = vsel %vm1076_vm9, %v1432_v36, %v1073_v45  ;;  %v1085_v49 = vmul.f32 %v1434_v46, %v1068_v37  ;;  %vm1090_vm13 = vweird.f32 %v1434_v46 }
 0x41c   : > { %v1082_v50 = vsel %vm1079_vm10, %v1081_v47, %v1077_v48  ;;  %vm1091_vm15 = vmor %vm1089_vm14, %vm1090_vm13 }
 0x41d   : > { %v1099_v52 = vmul.f32 %v1428_v32, %v1082_v50  ;;  %v1086_v53 = vsub.f32 1.0, %v1085_v49 }
 0x41f   : > { %v1101_v55 = vsel %vm1065_vm12, %v1082_v50, %v1099_v52  ;;  %v1087_v56 = vmul.f32 %v1434_v46, %v1086_v53 }
 0x420   : > { %1348 = vmatmul.msk.f32.vlgmr.msrb.gmra.mxu2 %vm2196_vm11, %v1101_v55 }
 0x421   : > { %v1088_v58 = vadd.f32 %v1434_v46, %v1087_v56 }
 0x423   : > { %v1092_v60 = vsel %vm1091_vm15, %v1434_v46, %v1088_v58 }
 0x424   : > { %v1097_v61 = vsel %vm1094_vm0, %v1096_v59, %v1092_v60 }
 0x425   : > { %v1100_v62 = vmul.f32 %v1430_v35, %v1097_v61 }
 0x427   : > { %v1102_v63 = vsel %vm1066_vm1, %v1097_v61, %v1100_v62 }
 0x428   : > { %1349 = vmatmul.msk.f32.gmra.mxu2 %vm2196_vm11, %v1102_v63 }
 0x429   : > { %1496 = shalt.err (!%p1493_p8)
}
 0x42a   : > { %s1572_s22 = smov 128   ;;  %s1573_s24 = smov 8   ;;  %1435 = vtanh.f32 %v2186_v18  ;;  %vm1052_vm2 = vcmp.ge.s32.totalorder %v2192_v41, 64  ;;  %vm1053_vm3 = vcmp.lt.s32.totalorder %v2192_v41, 80  ;;  %vm1048_vm5 = vcmp.lt.s32.totalorder %v2192_v41, 48 }
 0x42b   : > { %1364 = dma.vmem_to_hbm [thread:$0]  (%p1672_p5), %s1181_s15, 256, %s1183_s25, %s1163_s12, %s1572_s22, %s1572_s22, %s1573_s24   ;;  %vm2234_vm4 = vmand %vm1052_vm2, %vm1053_vm3  ;;  %1437 = vtanh.f32 %v2189_v29 }
 0x42c   : > { %s1328_s30 = sshll.u32 %s1655_s21, 1  ;;  %s2318_s15 = sshll.u32 %s2074_s29, 4 }
 0x42d   : > { %p427_p9 = scmp.lt.s32.totalorder %s1328_s30, 3  ;;  %s421_s25 = scalar_lea.vmem [#allocation6], %s2318_s15 }
 0x42e   : > { %s1196_s19 = scalar_lea.hbm %s2301_s11, %s1358_s16  ;;  %s1197_s14 = sshll.u32 %s421_s25, 4  ;;  %s1198_s14 = int_to_ptr.vmem [resolvable:$true] %s1197_s14 }
 0x42f   : > { %s2325_s30 = smov (!%p427_p9, %s1328_s30), 3  ;;  %s1168_s21 = scalar_lea.sflag [#allocation7], %s2074_s29 }
 0x430   : > { %s1329_s13 = sshll.u32 %s2325_s30, 3  ;;  %v1436_v4 = vpop.eup %1435  ;;  %s1199_s30 = sshll.u32 %s1196_s19, 4  ;;  %s1200_s30 = int_to_ptr.hbm [resolvable:$true] %s1199_s30 }
 0x431   : > { %s430_s9 = scalar_lea.vmem %s2291_s1, %s1329_s13  ;;  %v1438_v14 = vpop.eup %1437  ;;  %s1511_s16 = sshra.s32 %s1200_s30, 4  ;;  %s1512_s16 = int_to_ptr.hbm [resolvable:$true] %s1511_s16 }
 0x432   : > { %v1144_v2 = vld [vmem:[%s430_s9] sm:$0xff]  ;;  %v1145_v12 = vld [vmem:[%s430_s9 + $0x8] sm:$0xff]  ;;  %s1513_s13 = scalar_lea.hbm %s1512_s16, 16  ;;  %s1517_s9 = scalar_lea.hbm %s2301_s11, 32 }
 0x433   : > { %p1514_p10 = scmp.ne.s32.totalorder %s1512_s16, %s1513_s13  ;;  %p1518_p13 = scmp.lt.s32.totalorder %s1512_s16, %s2301_s11 }
 0x434   : > { %p1519_p0 = scmp.lt.s32.totalorder %s1517_s9, %s1513_s13 }
 0x435   : > { %p1515_p11 = pnand %p1514_p10, %p1672_p5 }
 0x436   : > { %p1520_p1 = por %p1519_p0, %p1518_p13 }
 0x437   : > { %p1516_p12 = pneg %p1515_p11 }
 0x439   : > { %p1521_p2 = pnand %p1520_p1, %p1516_p12 }
 0x4a3   : > { %v1138_v1 = vpop.f32.mrf.mxu2 }
 0x4a4   : > { %v1148_v3 = vsub.f32 1.0, %v1138_v1  ;;  %v1146_v5 = vmul.f32 %v1144_v2, %v1138_v1 }
 0x4a6   : > { %v1150_v6 = vmul.f32 %v1436_v4, %v1148_v3  ;;  %v1154_v7 = vsel %vm2234_vm4, %v1148_v3, 0.0 }
 0x4a7   : > { %v1156_v9 = vsel %vm2196_vm11, %v1138_v1, %v1154_v7 }
 0x4a8   : > { %v1152_v8 = vadd.f32 %v1150_v6, %v1146_v5 }
 0x4aa   : > { %v1158_v10 = vsel %vm1048_vm5, %v1152_v8, %v1156_v9 }
 0x4ab   : > { %1160 = vst [vmem:[%s421_s25] sm:$0xff] %v1158_v10  ;;  %v1141_v11 = vpop.f32.mrf.mxu2 }
 0x4ac   : > { %v1149_v13 = vsub.f32 1.0, %v1141_v11  ;;  %v1147_v15 = vmul.f32 %v1145_v12, %v1141_v11 }
 0x4ae   : > { %v1151_v16 = vmul.f32 %v1438_v14, %v1149_v13  ;;  %v1155_v17 = vsel %vm2234_vm4, %v1149_v13, 0.0 }
 0x4af   : > { %v1157_v19 = vsel %vm2196_vm11, %v1141_v11, %v1155_v17 }
 0x4b0   : > { %v1153_v18 = vadd.f32 %v1151_v16, %v1147_v15 }
 0x4b2   : > { %v1159_v20 = vsel %vm1048_vm5, %v1153_v18, %v1157_v19 }
 0x4b3   : > { %1161 = vst [vmem:[%s421_s25 + $0x8] sm:$0xff] %v1159_v20 }
 0x4b4   : > { %1524 = shalt.err (!%p1521_p2)
}
 0x4b5   : > { %1365 = dma.vmem_to_hbm [thread:$0]  (%p1672_p5), %s1198_s14, 256, %s1200_s30, %s1168_s21, %s1572_s22, %s1572_s22, %s1573_s24  }
 0x4b6 PF: > { %p1381_p3 = scmp.ge.s32.totalorder %s1567_s20, 2  ;;  %s1214_s29 = sand.u32 1, %s1555_s17  }
 0x4b7   : > { %s1215_s25 = scalar_lea.sflag [#allocation4], %s1214_s29 }
 0x4b8   : > { %p1373_p4 = pnand %p1381_p3, %p1676_p6 }
 0x4ba   : > { %p1374_p7 = pneg %p1373_p4 }
 0x4bc   : > { %1546 = dma.done.wait (%p1374_p7), %s1215_s25, 256  }
 0x4bd   : > { %1548 = vsyncadd (%p1374_p7), %s1215_s25, 4294967040  ;;  %s1225_s26 = scalar_lea.sflag [#allocation7], %s1214_s29 }
 0x4be   : > { %1550 = dma.done.wait (%p1374_p7), %s1225_s26, 256  }
 0x4bf   : > { %1552 = vsyncadd (%p1374_p7), %s1225_s26, 4294967040  ;;  %s2319_s27 = sld [smem:[#allocation11_spill]]  ;;  %p26_p5 = scmp.ge.s32.totalorder %s1659_s23, 4  }
 0x4c0   : > { %s2320_s19 = sld [smem:[#allocation12_spill]]  ;;  %s2321_s17 = smov %s1559_s18 }
 0x4c1   : > { %s2323_s20 = smov %s1659_s23  ;;  %28 = sbr.rel (!%p26_p5) target bundleno = 10 (0xa), region = 120 }
 0x4c5   : > { %s2322_s18 = smov %s2319_s27 }
 0x4c6   :  { %1231 = vsyncpa [#allocation3], 1 }
 0x4c7   :  { %1233 = vsyncpa [#allocation3 + $0x1], 1 }
 0x4c8   :  { %1234 = vsyncpa [#allocation4], 1 }
 0x4c9   :  { %1236 = vsyncpa [#allocation4 + $0x1], 1 }
 0x4ca   :  { %1237 = vsyncpa [#allocation7], 1 }
 0x4cb   :  { %1239 = vsyncpa [#allocation7 + $0x1], 1 }

</bundles_post_ra>
